<compile_context>
chip_gen: v7x
topology: tpu7x:2x2x1
jax: 0.10.0
libtpu: 0.0.40
codegen_flags: <defaults>
</compile_context>

<pallas_src>
import math
import functools

import jax
import jax.numpy as jnp
import numpy as np
from jax import lax
from jax.experimental import pallas as pl
from jax.experimental.pallas import tpu as pltpu

_HIGH = lax.Precision.HIGHEST


# ----------------------------------------------------------------------------
# Deterministic parameter setup (projection matrix), plain JAX "glue".
# ----------------------------------------------------------------------------
def orthogonal_matrix_chunk(key, cols):
    unstructured = jax.random.normal(key, (cols, cols), dtype=jnp.float32)
    q, _ = jnp.linalg.qr(unstructured)  # 'reduced'
    return q.T


def gaussian_orthogonal_random_matrix(key, nb_rows, nb_columns, scaling=0):
    nb_full_blocks = nb_rows // nb_columns
    keys = jax.random.split(key, nb_full_blocks + 2)
    blocks = []
    for i in range(nb_full_blocks):
        blocks.append(orthogonal_matrix_chunk(keys[i], nb_columns))
    remaining = nb_rows - nb_full_blocks * nb_columns
    if remaining > 0:
        q = orthogonal_matrix_chunk(keys[nb_full_blocks], nb_columns)
        blocks.append(q[:remaining])
    final_matrix = jnp.concatenate(blocks, axis=0)  # (nb_rows, nb_columns)
    if scaling == 0:
        multiplier = jnp.linalg.norm(
            jax.random.normal(keys[-1], (nb_rows, nb_columns), dtype=jnp.float32),
            axis=1,
        )
    elif scaling == 1:
        multiplier = math.sqrt(float(nb_columns)) * jnp.ones((nb_rows,), jnp.float32)
    else:
        raise ValueError(f"Invalid scaling {scaling}")
    return multiplier[:, None] * final_matrix  # diag(multiplier) @ final_matrix


# ----------------------------------------------------------------------------
# Pallas kernel: G heads per grid step, rows pre-flattened to (G*N, .).
# ----------------------------------------------------------------------------
def _enla_kernel(q_ref, k_ref, v_ref, pt_ref, o_ref, *,
                 eps, m_true, g, n, use_quadratic, attn_dtype):
    gn, d = q_ref.shape                  # (G*N, D)
    m_pad = pt_ref.shape[1]              # lane-aligned feature width (128)
    e = v_ref.shape[-1]

    proj_t = pt_ref[...]                 # (D, Mp) resident f32 RHS
    ratio = m_true ** (-0.5)             # ratio uses the TRUE feature count

    def softmax_features(x):             # x: (GN, D) f32
        dash = jnp.dot(x, proj_t, precision=_HIGH,
                       preferred_element_type=jnp.float32)            # (GN, Mp)
        diag = 0.5 * jnp.sum(x * x, axis=-1, keepdims=True)           # (GN, 1)
        return ratio * (jnp.exp(dash - diag) + eps)

    q_prime = softmax_features(q_ref[...].astype(jnp.float32))        # (GN, Mp)
    k_prime = softmax_features(k_ref[...].astype(jnp.float32))        # (GN, Mp)

    # Zero the padded feature columns of k' only: zeros propagate through every
    # contraction that the (garbage) padded q' columns take part in.
    if m_pad != m_true:
        col = lax.broadcasted_iota(jnp.int32, (gn, m_pad), 1)
        k_prime = jnp.where(col < m_true, k_prime, 0.0)

    v = v_ref[...].astype(jnp.float32)                                 # (GN, E)

    # Leading-dim split only (N % 8 == 0 keeps (8,128) tiles intact -> no copy).
    q3 = q_prime.reshape(g, n, m_pad)
    k3 = k_prime.reshape(g, n, m_pad)
    v3 = v.reshape(g, n, e)

    if use_quadratic:
        # Small-N path: quadratic form beats building the (Mp, E) context and
        # uses a 128-deep MXU contraction instead of K=N.
        a = jnp.einsum("gnm,gkm->gnk", q3, k3, precision=_HIGH,
                       preferred_element_type=jnp.float32)             # (G,N,N)
        denom = jnp.sum(a, axis=-1, keepdims=True)                     # (G,N,1)
        out = jnp.einsum("gnk,gke->gne", a, v3, precision=_HIGH,
                         preferred_element_type=jnp.float32)           # (G,N,E)
    else:
        # Large-N (linear) path; post-exp operands in bf16, f32 accumulate.
        k_cumsum = jnp.sum(k3, axis=1, keepdims=True)                  # (G,1,Mp)
        denom = jnp.sum(q3 * k_cumsum, axis=-1, keepdims=True)         # (G,N,1)
        qb, kb, vb = (t.astype(attn_dtype) for t in (q3, k3, v3))
        context = jnp.einsum("gnm,gne->gme", kb, vb,
                             preferred_element_type=jnp.float32)       # (G,Mp,E)
        out = jnp.einsum("gnm,gme->gne", qb, context.astype(attn_dtype),
                         preferred_element_type=jnp.float32)           # (G,N,E)

    out = out / denom          # exact division (approx reciprocal never a win)
    o_ref[...] = out.reshape(gn, e).astype(o_ref.dtype)


def _tpu_topology():
    """(num_tensorcores_per_chip, physical_vmem_bytes), conservative fallbacks."""
    vmem = 64 << 20            # v7x floor — safe lower bound for all generations
    num_tc = 1
    try:
        vmem = int(pltpu.get_tpu_info().vmem_capacity_bytes)
    except Exception:
        pass
    try:
        kind = (jax.devices()[0].device_kind or "").lower()
        if "v7" in kind or "7x" in kind:
            num_tc = 2
    except Exception:
        pass
    return num_tc, vmem


def enla_forward(q, k, v, projection_matrix, *, eps=1e-4, group_size=None):
    """q, k: (B, H, N, D); v: (B, H, N, E); projection_matrix: (M, D)."""
    B, H, N, D = q.shape
    E = v.shape[-1]
    M = projection_matrix.shape[0]
    BH = B * H
    assert N % 8 == 0, "sequence length must be a multiple of 8 (sublane tile)"

    # Lane-aligned, pre-transposed projection: (D, M_pad), padded cols are zero.
    M_pad = pl.cdiv(M, 128) * 128
    proj_t = jnp.zeros((D, M_pad), jnp.float32)
    proj_t = proj_t.at[:, :M].set(projection_matrix.T.astype(jnp.float32))

    # Quadratic-form crossover (per-row MACs: N*(Mp+E) vs ~2*Mp*E).
    use_quadratic = N <= (2 * M_pad * E) // (M_pad + E)

    num_tc, vmem_phys = _tpu_topology()

    # Per-step VMEM estimate: double-buffered I/O blocks + f32 intermediates.
    def step_bytes(g):
        io = 2 * g * N * (2 * D + 2 * E) * 4              # q,k,v,out (x2 buffers)
        inter = 4 * g * N * M_pad * 4                     # dash/prime for q and k
        attn = (g * N * N * 4) if use_quadratic else (g * (M_pad * E + M_pad) * 4)
        return io + inter + attn + 2 * D * M_pad * 4

    budget = int(0.7 * vmem_phys)
    if group_size is None:
        min_grid = min(num_tc, BH)        # require >=2 steps only on 2-TC chips
        candidates = [g for g in range(1, BH + 1)
                      if BH % g == 0 and BH // g >= min_grid
                      and step_bytes(g) <= budget]
        G = max(candidates) if candidates else 1
    else:
        G = group_size
    assert BH % G == 0

    qf = q.reshape(BH * N, D)     # free HBM reshapes; no in-kernel copies
    kf = k.reshape(BH * N, D)
    vf = v.reshape(BH * N, E)

    kernel = functools.partial(
        _enla_kernel, eps=eps, m_true=M, g=G, n=N,
        use_quadratic=use_quadratic, attn_dtype=jnp.bfloat16)

    vmem_limit = int(min(0.9 * vmem_phys, max(2 * step_bytes(G), 32 << 20)))

    out = pl.pallas_call(
        kernel,
        out_shape=jax.ShapeDtypeStruct((BH * N, E), q.dtype),
        grid_spec=pltpu.PrefetchScalarGridSpec(
            num_scalar_prefetch=0,
            grid=(BH // G,),
            in_specs=[
                pl.BlockSpec((G * N, D), lambda i: (i, 0)),
                pl.BlockSpec((G * N, D), lambda i: (i, 0)),
                pl.BlockSpec((G * N, E), lambda i: (i, 0)),
                pl.BlockSpec((D, M_pad), lambda i: (0, 0)),
            ],
            out_specs=pl.BlockSpec((G * N, E), lambda i: (i, 0)),
        ),
        compiler_params=pltpu.CompilerParams(
            dimension_semantics=("parallel",),
            vmem_limit_bytes=vmem_limit,
        ),
    )(qf, kf, vf, proj_t)

    return out.reshape(B, H, N, E)


# ----------------------------------------------------------------------------
# Pure-JAX reference (matches the PyTorch module's default forward path).
# Precision pinned to HIGHEST so TPU einsums don't silently drop to bf16 passes.
# ----------------------------------------------------------------------------
def enla_reference(q, k, v, projection_matrix, *, eps=1e-4):
    m = projection_matrix.shape[0]
    ratio = m ** (-0.5)

    def feat(x):
        dash = jnp.einsum("bhid,jd->bhij", x, projection_matrix, precision=_HIGH)
        diag = 0.5 * jnp.sum(x * x, axis=-1, keepdims=True)
        return ratio * (jnp.exp(dash - diag) + eps)

    qp, kp = feat(q), feat(k)
    k_cumsum = kp.sum(axis=-2)                                              # (B,H,M)
    d_inv = 1.0 / jnp.einsum("bhnd,bhd->bhn", qp, k_cumsum, precision=_HIGH)
    context = jnp.einsum("bhnd,bhne->bhde", kp, v, precision=_HIGH)         # (B,H,M,E)
    out = jnp.einsum("bhde,bhnd,bhn->bhne", context, qp, d_inv, precision=_HIGH)
    return out


if __name__ == "__main__":
    # Module hyper-parameters (ENLA defaults: generalized_attention=False,
    # no_projection=False, attn_drop=0.0 -> dropout is identity).
    dim_heads = 32
    nb_features = int(dim_heads * math.log(dim_heads))  # = 110

    B, H, N, D = 2, 4, 8, dim_heads
    E = dim_heads

    key = jax.random.PRNGKey(0)
    k_proj, k_q, k_k, k_v = jax.random.split(key, 4)

    projection_matrix = gaussian_orthogonal_random_matrix(
        k_proj, nb_features, dim_heads, scaling=0
    )

    # Moderate q/k scale (typical post-layernorm magnitude) keeps exp(dash-diag)
    # well-conditioned in f32.
    q = jax.random.normal(k_q, (B, H, N, D), dtype=jnp.float32) * 0.25
    k = jax.random.normal(k_k, (B, H, N, D), dtype=jnp.float32) * 0.25
    v = jax.random.normal(k_v, (B, H, N, E), dtype=jnp.float32)

    out = jax.block_until_ready(enla_forward(q, k, v, projection_matrix))
    ref = jax.block_until_ready(enla_reference(q, k, v, projection_matrix))

    assert out.shape == (B, H, N, E)
    max_err = float(np.max(np.abs(np.asarray(out) - np.asarray(ref))))
    assert np.allclose(np.asarray(out), np.asarray(ref), rtol=1e-3, atol=1e-3), max_err

    print("KERNEL_OK")
</pallas_src>

<mosaic_0001>
module attributes {stable_mosaic.version = 11 : i64} {
  func.func @_enla_kernel(%arg0: i32, %arg1: memref<64x32xf32, #tpu.memory_space<vmem>>, %arg2: memref<64x32xf32, #tpu.memory_space<vmem>>, %arg3: memref<64x32xf32, #tpu.memory_space<vmem>>, %arg4: memref<32x128xf32, #tpu.memory_space<vmem>>, %arg5: memref<64x32xf32, #tpu.memory_space<vmem>>) attributes {dimension_semantics = [#tpu.dimension_semantics<parallel>], iteration_bounds = array<i64: 1>, scalar_prefetch = 0 : i64, scratch_operands = 0 : i64, tpu.core_type = #tpu.core_type<tc>, window_params = [{transform_indices = @transform_0, window_bounds = array<i64: 64, 32>}, {transform_indices = @transform_1, window_bounds = array<i64: 64, 32>}, {transform_indices = @transform_2, window_bounds = array<i64: 64, 32>}, {pipeline_mode = #tpu.pipeline_mode<synchronous>, transform_indices = @transform_3, window_bounds = array<i64: 32, 128>}, {transform_indices = @transform_4, window_bounds = array<i64: 64, 32>}]} {
    %c0 = arith.constant 0 : index
    %c0_0 = arith.constant 0 : index
    %0 = vector.load %arg4[%c0, %c0_0] : memref<32x128xf32, #tpu.memory_space<vmem>>, vector<32x128xf32>
    %c0_1 = arith.constant 0 : index
    %c0_2 = arith.constant 0 : index
    %1 = vector.load %arg1[%c0_1, %c0_2] : memref<64x32xf32, #tpu.memory_space<vmem>>, vector<64x32xf32>
    %cst = arith.constant dense<0.000000e+00> : vector<64x128xf32>
    %2 = tpu.matmul %1, %0, %cst {dimension_numbers = #tpu.dot_dimension_numbers<[1], [0], [0], [1], [0, 0, 1, 1], [], []>, precision = #tpu.contract_precision<fp32>} : vector<64x32xf32>, vector<32x128xf32>, vector<64x128xf32> -> vector<64x128xf32>
    %3 = arith.mulf %1, %1 : vector<64x32xf32>
    %cst_3 = arith.constant dense<0.000000e+00> : vector<64xf32>
    %4 = vector.multi_reduction <add>, %3, %cst_3 [1] : vector<64x32xf32> to vector<64xf32>
    %5 = vector.shape_cast %4 : vector<64xf32> to vector<64x1xf32>
    %cst_4 = arith.constant 5.000000e-01 : f32
    %6 = vector.broadcast %cst_4 : f32 to vector<64x1xf32>
    %7 = arith.mulf %6, %5 : vector<64x1xf32>
    %8 = vector.broadcast %7 : vector<64x1xf32> to vector<64x128xf32>
    %9 = arith.subf %2, %8 : vector<64x128xf32>
    %10 = math.exp %9 : vector<64x128xf32>
    %cst_5 = arith.constant 9.99999974E-5 : f32
    %11 = vector.broadcast %cst_5 : f32 to vector<64x128xf32>
    %12 = arith.addf %10, %11 : vector<64x128xf32>
    %cst_6 = arith.constant 0.0953462571 : f32
    %13 = vector.broadcast %cst_6 : f32 to vector<64x128xf32>
    %14 = arith.mulf %13, %12 : vector<64x128xf32>
    %c0_7 = arith.constant 0 : index
    %c0_8 = arith.constant 0 : index
    %15 = vector.load %arg2[%c0_7, %c0_8] : memref<64x32xf32, #tpu.memory_space<vmem>>, vector<64x32xf32>
    %cst_9 = arith.constant dense<0.000000e+00> : vector<64x128xf32>
    %16 = tpu.matmul %15, %0, %cst_9 {dimension_numbers = #tpu.dot_dimension_numbers<[1], [0], [0], [1], [0, 0, 1, 1], [], []>, precision = #tpu.contract_precision<fp32>} : vector<64x32xf32>, vector<32x128xf32>, vector<64x128xf32> -> vector<64x128xf32>
    %17 = arith.mulf %15, %15 : vector<64x32xf32>
    %cst_10 = arith.constant dense<0.000000e+00> : vector<64xf32>
    %18 = vector.multi_reduction <add>, %17, %cst_10 [1] : vector<64x32xf32> to vector<64xf32>
    %19 = vector.shape_cast %18 : vector<64xf32> to vector<64x1xf32>
    %cst_11 = arith.constant 5.000000e-01 : f32
    %20 = vector.broadcast %cst_11 : f32 to vector<64x1xf32>
    %21 = arith.mulf %20, %19 : vector<64x1xf32>
    %22 = vector.broadcast %21 : vector<64x1xf32> to vector<64x128xf32>
    %23 = arith.subf %16, %22 : vector<64x128xf32>
    %24 = math.exp %23 : vector<64x128xf32>
    %cst_12 = arith.constant 9.99999974E-5 : f32
    %25 = vector.broadcast %cst_12 : f32 to vector<64x128xf32>
    %26 = arith.addf %24, %25 : vector<64x128xf32>
    %cst_13 = arith.constant 0.0953462571 : f32
    %27 = vector.broadcast %cst_13 : f32 to vector<64x128xf32>
    %28 = arith.mulf %27, %26 : vector<64x128xf32>
    %29 = tpu.iota {dimensions = array<i32: 1>} : vector<64x128xi32>
    %c110_i32 = arith.constant 110 : i32
    %30 = vector.broadcast %c110_i32 : i32 to vector<64x128xi32>
    %31 = arith.cmpi slt, %29, %30 : vector<64x128xi32>
    %cst_14 = arith.constant 0.000000e+00 : f32
    %32 = vector.broadcast %cst_14 : f32 to vector<64x128xf32>
    %33 = arith.select %31, %28, %32 : vector<64x128xi1>, vector<64x128xf32>
    %c0_15 = arith.constant 0 : index
    %c0_16 = arith.constant 0 : index
    %34 = vector.load %arg3[%c0_15, %c0_16] : memref<64x32xf32, #tpu.memory_space<vmem>>, vector<64x32xf32>
    %35 = vector.shape_cast %14 : vector<64x128xf32> to vector<8x8x128xf32>
    %36 = vector.shape_cast %33 : vector<64x128xf32> to vector<8x8x128xf32>
    %37 = vector.shape_cast %34 : vector<64x32xf32> to vector<8x8x32xf32>
    "tpu.trace_start"() <{level = 10 : i32, message = "gnm,gkm->gnk"}> : () -> ()
    %cst_17 = arith.constant dense<0.000000e+00> : vector<8x8x8xf32>
    %38 = tpu.matmul %35, %36, %cst_17 {dimension_numbers = #tpu.dot_dimension_numbers<[2], [2], [1], [1], [0, 0, 0, 1, 1, 1], [0], [0]>, precision = #tpu.contract_precision<fp32>} : vector<8x8x128xf32>, vector<8x8x128xf32>, vector<8x8x8xf32> -> vector<8x8x8xf32>
    "tpu.trace_stop"() : () -> ()
    %cst_18 = arith.constant dense<0.000000e+00> : vector<8x8xf32>
    %39 = vector.multi_reduction <add>, %38, %cst_18 [2] : vector<8x8x8xf32> to vector<8x8xf32>
    %40 = vector.shape_cast %39 : vector<8x8xf32> to vector<8x8x1xf32>
    "tpu.trace_start"() <{level = 10 : i32, message = "gnk,gke->gne"}> : () -> ()
    %cst_19 = arith.constant dense<0.000000e+00> : vector<8x8x32xf32>
    %41 = tpu.matmul %38, %37, %cst_19 {dimension_numbers = #tpu.dot_dimension_numbers<[2], [1], [1], [2], [0, 0, 0, 1, 1, 2], [0], [0]>, precision = #tpu.contract_precision<fp32>} : vector<8x8x8xf32>, vector<8x8x32xf32>, vector<8x8x32xf32> -> vector<8x8x32xf32>
    "tpu.trace_stop"() : () -> ()
    %42 = vector.broadcast %40 : vector<8x8x1xf32> to vector<8x8x32xf32>
    %43 = arith.divf %41, %42 : vector<8x8x32xf32>
    %44 = vector.shape_cast %43 : vector<8x8x32xf32> to vector<64x32xf32>
    %c0_20 = arith.constant 0 : index
    %c0_21 = arith.constant 0 : index
    %45 = vector.load %arg5[%c0_20, %c0_21] : memref<64x32xf32, #tpu.memory_space<vmem>>, vector<64x32xf32>
    tpu.vector_store %arg5[%c0_20, %c0_21], %44 {strides = array<i32>} : memref<64x32xf32, #tpu.memory_space<vmem>>, vector<64x32xf32>,
    return
  }
  func.func @transform_0(%arg0: i32) -> (i32, i32) {
    %c0_i32 = arith.constant 0 : i32
    %c0_i32_0 = arith.constant 0 : i32
    return %arg0, %c0_i32 : i32, i32
  }
  func.func @transform_1(%arg0: i32) -> (i32, i32) {
    %c0_i32 = arith.constant 0 : i32
    %c0_i32_0 = arith.constant 0 : i32
    return %arg0, %c0_i32 : i32, i32
  }
  func.func @transform_2(%arg0: i32) -> (i32, i32) {
    %c0_i32 = arith.constant 0 : i32
    %c0_i32_0 = arith.constant 0 : i32
    return %arg0, %c0_i32 : i32, i32
  }
  func.func @transform_3(%arg0: i32) -> (i32, i32) {
    %c0_i32 = arith.constant 0 : i32
    %c0_i32_0 = arith.constant 0 : i32
    %c0_i32_1 = arith.constant 0 : i32
    return %c0_i32, %c0_i32_0 : i32, i32
  }
  func.func @transform_4(%arg0: i32) -> (i32, i32) {
    %c0_i32 = arith.constant 0 : i32
    %c0_i32_0 = arith.constant 0 : i32
    return %arg0, %c0_i32 : i32, i32
  }
}

</mosaic_0001>

<bundles_post_ra>
// kernel: tpu_custom_call.1
= control target key start
LH: loop header
LB: loop body
LE: loop exit
PB: predicated region body
PF: predicated region fallthrough
CT: control target
= control target key end

     0   :  { %vm29_vm0 = vcmask 261120   ;;  %vm10493_vm1 = vmmov 0   ;;  %vm5405_vm3 = vcmask 64512   ;;  %s11762_s3 = inlined_call_operand.vmem [shape: f32[32,128], index: 3, kind: input, shape index: {}]   ;;  %s11763_s0 = inlined_call_operand.vmem [shape: f32[64,32], index: 0, kind: input, shape index: {}]   ;;  %s11764_s1 = inlined_call_operand.vmem [shape: f32[64,32], index: 1, kind: input, shape index: {}]   ;;  %s11765_s2 = inlined_call_operand.vmem [shape: f32[64,32], index: 2, kind: input, shape index: {}]   ;;  %s11766_s4 = inlined_call_operand.vmem [shape: f32[64,32], index: 4, kind: output, shape index: {}]  }
   0x1   :  { %v10522_v0 = vld [vmem:[%s11762_s3] sm:$0xff]  ;;  %v10527_v1 = vld [vmem:[%s11762_s3 + $0x8] sm:$0xff]  ;;  %v10532_v2 = vld [vmem:[%s11762_s3 + $0x10] sm:$0xff] }
   0x2   :  { %v55_v3 = vand.u32 4294901760, %v10522_v0  ;;  %v58_v4 = vand.u32 4294901760, %v10527_v1  ;;  %v10539_v5 = vld [vmem:[%s11762_s3 + $0x18] sm:$0xff]  ;;  %v61_v6 = vand.u32 4294901760, %v10532_v2  ;;  %v10545_v7 = vld [vmem:[%s11763_s0] sm:$0xff]  ;;  %v10560_v12 = vld [vmem:[%s11763_s0 + $0x8] sm:$0xff] }
   0x3   :  { %v10550_v8 = vld [vmem:[%s11764_s1] sm:$0xff]  ;;  %v64_v9 = vand.u32 4294901760, %v10539_v5  ;;  %v31_v10 = vsel %vm29_vm0, %v10545_v7, 0  ;;  %v10565_v13 = vld [vmem:[%s11764_s1 + $0x8] sm:$0xff]  ;;  %v10570_v14 = vld [vmem:[%s11763_s0 + $0x10] sm:$0xff]  ;;  %v34_v18 = vsel %vm29_vm0, %v10560_v12, 0 }
   0x4   :  { %v929_v11 = vsel %vm29_vm0, %v10550_v8, 0  ;;  %v10576_v15 = vpack.c.bf16 %v58_v4, %v55_v3  ;;  %v10578_v16 = vand.u32 4294901760, %v31_v10  ;;  %v10587_v19 = vld [vmem:[%s11764_s1 + $0x10] sm:$0xff]  ;;  %v10592_v20 = vld [vmem:[%s11763_s0 + $0x18] sm:$0xff]  ;;  %v10605_v23 = vand.u32 4294901760, %v34_v18  ;;  %v10647_v38 = vld [vmem:[%s11763_s0 + $0x20] sm:$0xff] }
   0x5   :  { %v10580_v17 = vand.u32 4294901760, %v929_v11  ;;  %v10597_v21 = vld [vmem:[%s11764_s1 + $0x18] sm:$0xff]  ;;  %v10603_v22 = vpack.c.bf16 %v64_v9, %v61_v6  ;;  %v932_v24 = vsel %vm29_vm0, %v10565_v13, 0  ;;  %v37_v25 = vsel %vm29_vm0, %v10570_v14, 0  ;;  %v10680_v51 = vld [vmem:[%s11764_s1 + $0x20] sm:$0xff]  ;;  %v10696_v60 = vld [vmem:[%s11763_s0 + $0x28] sm:$0xff] }
   0x6   :  { %10107 = vmatprep.subr.bf16.mxu0 %v10576_v15  ;;  %10155 = vmatprep.subr.bf16.mxu1 %v10576_v15  ;;  %v10614_v26 = vsub.f32 %v31_v10, %v10578_v16  ;;  %v10619_v28 = vand.u32 4294901760, %v932_v24  ;;  %v10621_v29 = vand.u32 4294901760, %v37_v25  ;;  %v10626_v30 = vsub.f32 %v34_v18, %v10605_v23 }
   0x7   :  { %v10617_v27 = vsub.f32 %v929_v11, %v10580_v17  ;;  %10109 = vmatpush3.bf16.msra.mxu0 %v10576_v15  ;;  %10157 = vmatpush3.bf16.msra.mxu1 %v10576_v15  ;;  %v935_v31 = vsel %vm29_vm0, %v10587_v19, 0  ;;  %v40_v32 = vsel %vm29_vm0, %v10592_v20, 0  ;;  %v938_v33 = vsel %vm29_vm0, %v10597_v21, 0 }
   0x8   :  { %10111 = vmatprep.subr.bf16.mxu0 %v10603_v22  ;;  %10159 = vmatprep.subr.bf16.mxu1 %v10603_v22  ;;  %v11776_v34 = vand.u32 4294901760, %v10614_v26  ;;  %v10639_v36 = vsub.f32 %v932_v24, %v10619_v28  ;;  %v10642_v37 = vsub.f32 %v37_v25, %v10621_v29  ;;  %v11773_v39 = vand.u32 4294901760, %v10626_v30 }
   0x9   :  { %v11775_v35 = vand.u32 4294901760, %v10617_v27  ;;  %v10650_v40 = vand.u32 4294901760, %v935_v31  ;;  %v10652_v41 = vand.u32 4294901760, %v40_v32  ;;  %v10654_v42 = vand.u32 4294901760, %v938_v33 }
   0xa   :  { %v126_v43 = vsub.f32 %v10614_v26, %v11776_v34  ;;  %v11771_v45 = vand.u32 4294901760, %v10639_v36  ;;  %v11772_v46 = vand.u32 4294901760, %v10642_v37  ;;  %v136_v47 = vsub.f32 %v10626_v30, %v11773_v39 }
   0xb   :  { %v1024_v44 = vsub.f32 %v10617_v27, %v11775_v35  ;;  %10113 = vmatpush3.bf16.msra.mxu0 %v10603_v22  ;;  %10161 = vmatpush3.bf16.msra.mxu1 %v10603_v22  ;;  %v10670_v48 = vsub.f32 %v935_v31, %v10650_v40  ;;  %v10673_v49 = vsub.f32 %v40_v32, %v10652_v41  ;;  %v43_v50 = vsel %vm29_vm0, %v10647_v38, 0 }
   0xc   :  { %v127_v52 = vand.u32 4294901760, %v126_v43  ;;  %v1034_v54 = vsub.f32 %v10639_v36, %v11771_v45  ;;  %v146_v55 = vsub.f32 %v10642_v37, %v11772_v46  ;;  %v137_v56 = vand.u32 4294901760, %v136_v47  ;;  %v10734_v47 = vld [vmem:[%s11763_s0 + $0x30] sm:$0xff] }
   0xd   :  { %v1025_v53 = vand.u32 4294901760, %v1024_v44  ;;  %v11770_v57 = vand.u32 4294901760, %v10670_v48  ;;  %v11768_v58 = vand.u32 4294901760, %v10673_v49  ;;  %v10691_v59 = vsub.f32 %v938_v33, %v10654_v42  ;;  %v10729_v44 = vld [vmem:[%s11764_s1 + $0x28] sm:$0xff]  ;;  %11789 = vst [vmem:[#allocation2_spill] sm:$0xff] %v10734_v47 }
   0xe   :  { %9394 = vmatprep.mubr.f32.mxu0 %v127_v52  ;;  %v1035_v61 = vand.u32 4294901760, %v1034_v54  ;;  %v147_v62 = vand.u32 4294901760, %v146_v55  ;;  %v10698_v63 = vand.u32 4294901760, %v43_v50  ;;  %v941_v10 = vsel %vm29_vm0, %v10680_v51, 0  ;;  %v10750_v55 = vld [vmem:[%s11764_s1 + $0x30] sm:$0xff] }
   0xf   :  { %9514 = vmatprep.mubr.f32.mxu1 %v1025_v53  ;;  %9395 = vmatmul.mubr.f32.vlgmr.msra.gmra.mrb[0].mxu0 %v137_v56  ;;  %v1044_v11 = vsub.f32 %v10670_v48, %v11770_v57  ;;  %v156_v18 = vsub.f32 %v10673_v49, %v11768_v58  ;;  %v11767_v24 = vand.u32 4294901760, %v10691_v59  ;;  %v10709_v25 = vand.u32 4294901760, %v941_v10  ;;  %11790 = vst [vmem:[#allocation3_spill] sm:$0xff] %v10750_v55 }
  0x10   :  { %9515 = vmatmul.mubr.f32.vlgmr.msra.gmra.mrb[0].mxu1 %v1035_v61  ;;  %9397 = vmatprep.mubr.f32.mxu0 %v147_v62  ;;  %v10712_v31 = vsub.f32 %v43_v50, %v10698_v63  ;;  %v46_v32 = vsel %vm29_vm0, %v10696_v60, 0  ;;  %v10719_v33 = vsub.f32 %v10522_v0, %v55_v3  ;;  %v10724_v43 = vsub.f32 %v10527_v1, %v58_v4 }
  0x11   :  { %v1045_v50 = vand.u32 4294901760, %v1044_v11  ;;  %v157_v52 = vand.u32 4294901760, %v156_v18  ;;  %v1054_v0 = vsub.f32 %v10691_v59, %v11767_v24  ;;  %v10740_v3 = vsub.f32 %v941_v10, %v10709_v25 }
  0x12   :  { %v11769_v1 = vand.u32 4294901760, %v10712_v31  ;;  %v10743_v4 = vand.u32 4294901760, %v46_v32  ;;  %v11778_v53 = vand.u32 4294901760, %v10719_v33  ;;  %v11777_v54 = vand.u32 4294901760, %v10724_v43 }
  0x13   :  { %9517 = vmatprep.mubr.f32.mxu1 %v1045_v50  ;;  %9398 = vmatmul.mubr.f32.gmra.mrb[2].mxu0 %v157_v52  ;;  %v1055_v56 = vand.u32 4294901760, %v1054_v0  ;;  %v11774_v61 = vand.u32 4294901760, %v10740_v3  ;;  %v944_v62 = vsel %vm29_vm0, %v10729_v44, 0  ;;  %v49_v10 = vsel %vm29_vm0, %v10734_v47, 0 }
  0x14   :  { %v166_v11 = vsub.f32 %v10712_v31, %v11769_v1  ;;  %v10761_v18 = vsub.f32 %v46_v32, %v10743_v4  ;;  %v207_v50 = vsub.f32 %v10719_v33, %v11778_v53  ;;  %v214_v52 = vsub.f32 %v10724_v43, %v11777_v54  ;;  %v10781_v1 = vld [vmem:[%s11763_s0 + $0x38] sm:$0xff] }
  0x15   :  { %9518 = vmatmul.mubr.f32.gmra.mrb[2].mxu1 %v1055_v56  ;;  %v1064_v0 = vsub.f32 %v10740_v3, %v11774_v61  ;;  %v10772_v24 = vand.u32 4294901760, %v944_v62  ;;  %v10774_v58 = vand.u32 4294901760, %v49_v10  ;;  %v947_v32 = vsel %vm29_vm0, %v10750_v55, 0  ;;  %11791 = vst [vmem:[#allocation4_spill] sm:$0xff] %v10781_v1  ;;  %v10795_v54 = vld [vmem:[%s11764_s1 + $0x38] sm:$0xff] }
  0x16   :  { %v167_v57 = vand.u32 4294901760, %v166_v11  ;;  %v11779_v45 = vand.u32 4294901760, %v10761_v18  ;;  %v208_v56 = vand.u32 4294901760, %v207_v50  ;;  %v215_v46 = vand.u32 4294901760, %v214_v52  ;;  %11792 = vst [vmem:[#allocation5_spill] sm:$0xff] %v10795_v54 }
  0x17   :  { %v1065_v39 = vand.u32 4294901760, %v1064_v0  ;;  %v10785_v61 = vsub.f32 %v944_v62, %v10772_v24  ;;  %v10788_v35 = vsub.f32 %v49_v10, %v10774_v58  ;;  %v10790_v34 = vand.u32 4294901760, %v947_v32 }
  0x18   :  { %9400 = vmatprep.mubr.f32.mxu0 %v167_v57  ;;  %v176_v11 = vsub.f32 %v10761_v18, %v11779_v45  ;;  %v10114_v50 = vpack.c.bf16 %v215_v46, %v208_v56  ;;  %v52_v62 = vsel %vm29_vm0, %v10781_v1, 0  ;;  %v10805_v10 = vsub.f32 %v10532_v2, %v61_v6 }
  0x19   :  { %9520 = vmatprep.mubr.f32.mxu1 %v1065_v39  ;;  %v11781_v52 = vand.u32 4294901760, %v10785_v61  ;;  %v11783_v0 = vand.u32 4294901760, %v10788_v35  ;;  %v10810_v57 = vsub.f32 %v947_v32, %v10790_v34  ;;  %v10812_v53 = vand.u32 4294901760, %v52_v62 }
  0x1a   :  { %v177_v45 = vand.u32 4294901760, %v176_v11  ;;  %10115 = vmatprep.subr.bf16.mxu0 %v10114_v50  ;;  %10163 = vmatprep.subr.bf16.mxu1 %v10114_v50  ;;  %v11784_v46 = vand.u32 4294901760, %v10805_v10  ;;  %v10818_v2 = vsub.f32 %v10539_v5, %v64_v9  ;;  %v950_v6 = vsel %vm29_vm0, %v10795_v54, 0 }
  0x1b   :  { %v1074_v39 = vsub.f32 %v10785_v61, %v11781_v52  ;;  %10117 = vmatpush3.bf16.msra.mxu0 %v10114_v50  ;;  %10165 = vmatpush3.bf16.msra.mxu1 %v10114_v50  ;;  %v186_v32 = vsub.f32 %v10788_v35, %v11783_v0  ;;  %v11787_v56 = vand.u32 4294901760, %v10810_v57  ;;  %v10830_v11 = vsub.f32 %v52_v62, %v10812_v53 }
  0x1c   :  { %9401 = vmatmul.mubr.f32.gmra.mrb[4].mxu0 %v177_v45  ;;  %v221_v5 = vsub.f32 %v10805_v10, %v11784_v46  ;;  %v11788_v9 = vand.u32 4294901760, %v10818_v2  ;;  %v10836_v55 = vand.u32 4294901760, %v950_v6  ;;  %v1738_v50 = vmul.f32 %v10550_v8, %v10550_v8 }
  0x1d   :  { %v1075_v52 = vand.u32 4294901760, %v1074_v39  ;;  %v187_v54 = vand.u32 4294901760, %v186_v32  ;;  %v1084_v0 = vsub.f32 %v10810_v57, %v11787_v56  ;;  %v195_v62 = vand.u32 4294901760, %v10830_v11 }
  0x1e   :  { %v222_v45 = vand.u32 4294901760, %v221_v5  ;;  %v228_v46 = vsub.f32 %v10818_v2, %v11788_v9  ;;  %v10848_v47 = vsub.f32 %v950_v6, %v10836_v55  ;;  %v1746_v56 = vsel %vm29_vm0, %v1738_v50, 0.0 }
  0x1f   :  { %9521 = vmatmul.mubr.f32.gmra.mrb[4].mxu1 %v1075_v52  ;;  %9403 = vmatprep.mubr.f32.mxu0 %v187_v54  ;;  %v1085_v1 = vand.u32 4294901760, %v1084_v0  ;;  %v196_v8 = vsub.f32 %v10830_v11, %v195_v62  ;;  %v840_v5 = vmul.f32 %v10545_v7, %v10545_v7  ;;  %v10122_v0 = vpack.c.bf16 %v10724_v43, %v10719_v33 }
  0x20   :  { %v229_v39 = vand.u32 4294901760, %v228_v46  ;;  %v1093_v32 = vand.u32 4294901760, %v10848_v47  ;;  %1747 = vadd.xlane.f32.xlu1 %v1746_v56  ;;  %v10126_v7 = vpack.c.bf16 %v10818_v2, %v10805_v10  ;;  %v841_v56 = vmul.f32 %v10560_v12, %v10560_v12 }
  0x21   :  { %9523 = vmatprep.mubr.f32.mxu1 %v1085_v1  ;;  %v197_v9 = vand.u32 4294901760, %v196_v8  ;;  %v848_v52 = vsel %vm29_vm0, %v840_v5, 0.0  ;;  %v1739_v1 = vmul.f32 %v10565_v13, %v10565_v13  ;;  %v843_v13 = vmul.f32 %v10592_v20, %v10592_v20 }
  0x22   :  { %v10118_v6 = vpack.c.bf16 %v229_v39, %v222_v45  ;;  %v1094_v54 = vsub.f32 %v10848_v47, %v1093_v32  ;;  %849 = vadd.xlane.f32.xlu0 %v848_v52  ;;  %v851_v12 = vsel %vm29_vm0, %v841_v56, 0.0  ;;  %v842_v50 = vmul.f32 %v10570_v14, %v10570_v14 }
  0x23   :  { %9404 = vmatmul.mubr.f32.gmra.mrb[6].mxu0 %v197_v9  ;;  %v1749_v9 = vsel %vm29_vm0, %v1739_v1, 0.0  ;;  %v857_v20 = vsel %vm29_vm0, %v843_v13, 0.0  ;;  %v11793_v14 = vand.u32 4294901760, %v10719_v33  ;;  %v11794_v8 = vand.u32 4294901760, %v10724_v43  ;;  %v11808_v13 = vld [vmem:[#allocation2_spill] sm:$0xff] }
  0x24   :  { %10119 = vmatprep.subr.bf16.mxu0 %v10118_v6  ;;  %v1095_v46 = vand.u32 4294901760, %v1094_v54  ;;  %10167 = vmatprep.subr.bf16.mxu1 %v10118_v6  ;;  %v854_v45 = vsel %vm29_vm0, %v842_v50, 0.0  ;;  %v1741_v5 = vmul.f32 %v10597_v21, %v10597_v21  ;;  %v845_v33 = vmul.f32 %v10696_v60, %v10696_v60 }
  0x25   :  { %10121 = vmatpush3.bf16.msra.mxu0 %v10118_v6  ;;  %10169 = vmatpush3.bf16.msra.mxu1 %v10118_v6  ;;  %v10138_v39 = vpack.c.bf16 %v11794_v8, %v11793_v14  ;;  %v1740_v6 = vmul.f32 %v10587_v19, %v10587_v19  ;;  %v844_v43 = vmul.f32 %v10647_v38, %v10647_v38  ;;  %v11795_v52 = vand.u32 4294901760, %v10614_v26 }
  0x26   :  { %9524 = vmatmul.mubr.f32.gmra.mrb[6].mxu1 %v1095_v46  ;;  %9414 = vmatprep.mubr.f32.mxu0 %v10578_v16  ;;  %v1755_v21 = vsel %vm29_vm0, %v1741_v5, 0.0  ;;  %v863_v60 = vsel %vm29_vm0, %v845_v33, 0.0  ;;  %v11796_v38 = vand.u32 4294901760, %v10805_v10  ;;  %v11799_v1 = vand.u32 4294901760, %v10626_v30 }
  0x27   :  { %9534 = vmatprep.mubr.f32.mxu1 %v10580_v17  ;;  %10123 = vmatprep.subr.bf16.mxu0 %v10122_v0  ;;  %v1752_v19 = vsel %vm29_vm0, %v1740_v6, 0.0  ;;  %v860_v54 = vsel %vm29_vm0, %v844_v43, 0.0  ;;  %v11800_v56 = vand.u32 4294901760, %v10642_v37  ;;  %v1743_v10 = vmul.f32 %v10729_v44, %v10729_v44  ;;  %v11806_v44 = vld [vmem:[#allocation4_spill] sm:$0xff] }
  0x28   :  { %9415 = vmatmul.mubr.f32.vlgmr.msra.gmra.mrb[0].mxu0 %v10605_v23  ;;  %10171 = vmatprep.subr.bf16.mxu1 %v10122_v0  ;;  %v11811_v50 = vand.u32 4294901760, %v10785_v61 }
  0x29   :  { %9417 = vmatprep.mubr.f32.mxu0 %v10621_v29  ;;  %10125 = vmatpush3.bf16.msra.mxu0 %v10122_v0 }
  0x2a   :  { %9535 = vmatmul.mubr.f32.vlgmr.msra.gmra.mrb[0].mxu1 %v10619_v28  ;;  %10127 = vmatprep.subr.bf16.mxu0 %v10126_v7 }
  0x2b   :  { %9537 = vmatprep.mubr.f32.mxu1 %v10650_v40  ;;  %10173 = vmatpush3.bf16.msra.mxu1 %v10122_v0  ;;  %v11797_v0 = vand.u32 4294901760, %v10818_v2  ;;  %v11802_v2 = vand.u32 4294901760, %v10670_v48 }
  0x2c   :  { %9418 = vmatmul.mubr.f32.gmra.mrb[2].mxu0 %v10652_v41  ;;  %10175 = vmatprep.subr.bf16.mxu1 %v10126_v7 }
  0x2d   :  { %9420 = vmatprep.mubr.f32.mxu0 %v10698_v63  ;;  %10129 = vmatpush3.bf16.msra.mxu0 %v10126_v7  ;;  %v10142_v46 = vpack.c.bf16 %v11797_v0, %v11796_v38 }
  0x2e   :  { %9538 = vmatmul.mubr.f32.gmra.mrb[2].mxu1 %v10654_v42  ;;  %10131 = vmatprep.subr.bf16.mxu0 %v10576_v15 }
  0x2f   :  { %9540 = vmatprep.mubr.f32.mxu1 %v10709_v25  ;;  %10177 = vmatpush3.bf16.msra.mxu1 %v10126_v7  ;;  %v11798_v7 = vand.u32 4294901760, %v10617_v27 }
  0x30   :  { %9421 = vmatmul.mubr.f32.gmra.mrb[4].mxu0 %v10743_v4  ;;  %10179 = vmatprep.subr.bf16.mxu1 %v10576_v15 }
  0x31   :  { %9423 = vmatprep.mubr.f32.mxu0 %v10774_v58  ;;  %1750 = vadd.xlane.f32.xlu1 %v1749_v9  ;;  %v847_v9 = vmul.f32 %v11806_v44, %v11806_v44 }
  0x32   :  { %9541 = vmatmul.mubr.f32.gmra.mrb[4].mxu1 %v10772_v24  ;;  %852 = vadd.xlane.f32.xlu0 %v851_v12  ;;  %v11809_v12 = vand.u32 4294901760, %v10761_v18 }
  0x33   :  { %9543 = vmatprep.mubr.f32.mxu1 %v10790_v34 }
  0x34   :  { %9424 = vmatmul.mubr.f32.gmra.mrb[6].mxu0 %v10812_v53 }
  0x35   :  { %9434 = vmatprep.mubr.f32.mxu0 %v10614_v26  ;;  %858 = vadd.xlane.f32.xlu1 %v857_v20  ;;  %v11801_v26 = vand.u32 4294901760, %v10639_v36  ;;  %v11812_v20 = vand.u32 4294901760, %v10810_v57 }
  0x36   :  { %9544 = vmatmul.mubr.f32.gmra.mrb[6].mxu1 %v10836_v55  ;;  %855 = vadd.xlane.f32.xlu0 %v854_v45 }
  0x37   :  { %9554 = vmatprep.mubr.f32.mxu1 %v10617_v27  ;;  %v1742_v27 = vmul.f32 %v10680_v51, %v10680_v51  ;;  %v11807_v51 = vand.u32 4294901760, %v10740_v3 }
  0x38   :  { %9435 = vmatmul.mubr.f32.vlgmr.msra.gmra.mrb[0].mxu0 %v10626_v30  ;;  %v11803_v30 = vand.u32 4294901760, %v10673_v49 }
  0x39   :  { %9437 = vmatprep.mubr.f32.mxu0 %v10642_v37  ;;  %10133 = vmatpush3.bf16.msra.mxu0 %v10576_v15  ;;  %v11804_v37 = vand.u32 4294901760, %v10712_v31 }
  0x3a   :  { %9555 = vmatmul.mubr.f32.vlgmr.msra.gmra.mrb[0].mxu1 %v10639_v36  ;;  %10135 = vmatprep.subr.bf16.mxu0 %v10603_v22  ;;  %v11805_v36 = vand.u32 4294901760, %v10691_v59 }
  0x3b   :  { %9557 = vmatprep.mubr.f32.mxu1 %v10670_v48  ;;  %10181 = vmatpush3.bf16.msra.mxu1 %v10576_v15  ;;  %v1761_v48 = vsel %vm29_vm0, %v1743_v10, 0.0 }
  0x3c   :  { %9438 = vmatmul.mubr.f32.gmra.mrb[2].mxu0 %v10673_v49  ;;  %10183 = vmatprep.subr.bf16.mxu1 %v10603_v22  ;;  %v1758_v49 = vsel %vm29_vm0, %v1742_v27, 0.0 }
  0x3d   :  { %9440 = vmatprep.mubr.f32.mxu0 %v10712_v31  ;;  %10137 = vmatpush3.bf16.msra.mxu0 %v10603_v22  ;;  %v846_v31 = vmul.f32 %v11808_v13, %v11808_v13 }
  0x3e   :  { %9558 = vmatmul.mubr.f32.gmra.mrb[2].mxu1 %v10691_v59  ;;  %10139 = vmatprep.subr.bf16.mxu0 %v10138_v39  ;;  %v11810_v59 = vand.u32 4294901760, %v10788_v35 }
  0x3f   :  { %9560 = vmatprep.mubr.f32.mxu1 %v10740_v3  ;;  %10185 = vmatpush3.bf16.msra.mxu1 %v10603_v22  ;;  %v869_v3 = vsel %vm29_vm0, %v847_v9, 0.0  ;;  %v866_v45 = vsel %vm29_vm0, %v846_v31, 0.0 }
  0x40   :  { %9441 = vmatmul.mubr.f32.gmra.mrb[4].mxu0 %v10761_v18  ;;  %10187 = vmatprep.subr.bf16.mxu1 %v10138_v39  ;;  %v11814_v18 = vld [vmem:[#allocation3_spill] sm:$0xff] }
  0x41   :  { %9443 = vmatprep.mubr.f32.mxu0 %v10788_v35  ;;  %1756 = vadd.xlane.f32.xlu1 %v1755_v21  ;;  %v11813_v35 = vld [vmem:[#allocation5_spill] sm:$0xff] }
  0x42   :  { %9561 = vmatmul.mubr.f32.gmra.mrb[4].mxu1 %v10785_v61  ;;  %1753 = vadd.xlane.f32.xlu0 %v1752_v19  ;;  %v1745_v61 = vmul.f32 %v11813_v35, %v11813_v35 }
  0x43   :  { %9563 = vmatprep.mubr.f32.mxu1 %v10810_v57  ;;  %v1744_v57 = vmul.f32 %v11814_v18, %v11814_v18 }
  0x44   :  { %9444 = vmatmul.mubr.f32.gmra.mrb[6].mxu0 %v10830_v11 }
  0x45   :  { %9454 = vmatprep.mubr.f32.mxu0 %v11795_v52  ;;  %864 = vadd.xlane.f32.xlu1 %v863_v60  ;;  %v1764_v11 = vsel %vm29_vm0, %v1744_v57, 0.0 }
  0x46   :  { %9564 = vmatmul.mubr.f32.gmra.mrb[6].mxu1 %v10848_v47  ;;  %861 = vadd.xlane.f32.xlu0 %v860_v54  ;;  %v1767_v47 = vsel %vm29_vm0, %v1745_v61, 0.0 }
  0x47   :  { %9574 = vmatprep.mubr.f32.mxu1 %v11798_v7 }
  0x48   :  { %9455 = vmatmul.mubr.f32.vlgmr.msra.gmra.mrb[0].mxu0 %v11799_v1 }
  0x49   :  { %9457 = vmatprep.mubr.f32.mxu0 %v11800_v56  ;;  %10141 = vmatpush3.bf16.msra.mxu0 %v10138_v39 }
  0x4a   :  { %9575 = vmatmul.mubr.f32.vlgmr.msra.gmra.mrb[0].mxu1 %v11801_v26  ;;  %10143 = vmatprep.subr.bf16.mxu0 %v10142_v46 }
  0x4b   :  { %9577 = vmatprep.mubr.f32.mxu1 %v11802_v2  ;;  %10189 = vmatpush3.bf16.msra.mxu1 %v10138_v39 }
  0x4c   :  { %9458 = vmatmul.mubr.f32.gmra.mrb[2].mxu0 %v11803_v30  ;;  %10191 = vmatprep.subr.bf16.mxu1 %v10142_v46 }
  0x4d   :  { %9460 = vmatprep.mubr.f32.mxu0 %v11804_v37  ;;  %10145 = vmatpush3.bf16.msra.mxu0 %v10142_v46 }
  0x4e   :  { %9578 = vmatmul.mubr.f32.gmra.mrb[2].mxu1 %v11805_v36  ;;  %10147 = vmatprep.subr.bf16.mxu0 %v10576_v15 }
  0x4f   :  { %9580 = vmatprep.mubr.f32.mxu1 %v11807_v51  ;;  %10193 = vmatpush3.bf16.msra.mxu1 %v10142_v46 }
  0x50   :  { %9461 = vmatmul.mubr.f32.gmra.mrb[4].mxu0 %v11809_v12  ;;  %10195 = vmatprep.subr.bf16.mxu1 %v10576_v15 }
  0x51   :  { %9463 = vmatprep.mubr.f32.mxu0 %v11810_v59  ;;  %1762 = vadd.xlane.f32.xlu1 %v1761_v48  ;;  %v1818_v59 = vlaneseq }
  0x52   :  { %9581 = vmatmul.mubr.f32.gmra.mrb[4].mxu1 %v11811_v50  ;;  %1759 = vadd.xlane.f32.xlu0 %v1758_v49 }
  0x53   :  { %9583 = vmatprep.mubr.f32.mxu1 %v11812_v20 }
  0x54   :  { %9464 = vmatmul.mubr.f32.gmra.mrb[6].mxu0 %v195_v62 }
  0x55   :  { %9474 = vmatprep.mubr.f32.mxu0 %v10578_v16  ;;  %870 = vadd.xlane.f32.xlu1 %v869_v3 }
  0x56   :  { %9584 = vmatmul.mubr.f32.gmra.mrb[6].mxu1 %v1093_v32  ;;  %867 = vadd.xlane.f32.xlu0 %v866_v45 }
  0x57   :  { %9594 = vmatprep.mubr.f32.mxu1 %v10580_v17 }
  0x58   :  { %9475 = vmatmul.mubr.f32.vlgmr.msra.gmra.mrb[0].mxu0 %v10605_v23 }
  0x59   :  { %9477 = vmatprep.mubr.f32.mxu0 %v10621_v29  ;;  %10149 = vmatpush3.bf16.msra.mxu0 %v10576_v15 }
  0x5a   :  { %9595 = vmatmul.mubr.f32.vlgmr.msra.gmra.mrb[0].mxu1 %v10619_v28  ;;  %10151 = vmatprep.subr.bf16.mxu0 %v10603_v22 }
  0x5b   :  { %9597 = vmatprep.mubr.f32.mxu1 %v10650_v40  ;;  %10197 = vmatpush3.bf16.msra.mxu1 %v10576_v15  ;;  %v10492_v15 = vmov 0.0  }
  0x5c   :  { %9478 = vmatmul.mubr.f32.gmra.mrb[2].mxu0 %v10652_v41  ;;  %10199 = vmatprep.subr.bf16.mxu1 %v10603_v22 }
  0x5d   :  { %9480 = vmatprep.mubr.f32.mxu0 %v10698_v63  ;;  %10153 = vmatpush3.bf16.msra.mxu0 %v10603_v22 }
  0x5e   :  { %9598 = vmatmul.mubr.f32.gmra.mrb[2].mxu1 %v10654_v42  ;;  %1768 = vadd.xlane.f32.xlu1 %v1767_v47 }
  0x5f   :  { %9600 = vmatprep.mubr.f32.mxu1 %v10709_v25  ;;  %10201 = vmatpush3.bf16.msra.mxu1 %v10603_v22 }
  0x60   :  { %9481 = vmatmul.mubr.f32.gmra.mrb[4].mxu0 %v10743_v4  ;;  %1765 = vadd.xlane.f32.xlu0 %v1764_v11 }
  0x61   :  { %9483 = vmatprep.mubr.f32.mxu0 %v10774_v58  ;;  %9656 = vmatprep.subr.mxu1 %v10492_v15 }
  0x62   :  { %9601 = vmatmul.mubr.f32.gmra.mrb[4].mxu1 %v10772_v24  ;;  %9626 = vmatprep.subr.mxu0 %v10492_v15 }
  0x63   :  { %9603 = vmatprep.mubr.f32.mxu1 %v10790_v34 }
  0x64   :  { %9484 = vmatmul.mubr.f32.gmra.mrb[6].mxu0 %v10812_v53 }
  0x65   :  { %9494 = vmatprep.mubr.f32.mxu0 %v10578_v16 }
  0x66   :  { %9604 = vmatmul.mubr.f32.gmra.mrb[6].mxu1 %v10836_v55 }
  0x67   :  { %9614 = vmatprep.mubr.f32.mxu1 %v10580_v17 }
  0x68   :  { %9495 = vmatmul.mubr.f32.vlgmr.msra.gmra.mrb[0].mxu0 %v10605_v23 }
  0x69   :  { %9497 = vmatprep.mubr.f32.mxu0 %v10621_v29 }
  0x6a   :  { %9615 = vmatmul.mubr.f32.vlgmr.msra.gmra.mrb[0].mxu1 %v10619_v28 }
  0x6b   :  { %9617 = vmatprep.mubr.f32.mxu1 %v10650_v40 }
  0x6c   :  { %9498 = vmatmul.mubr.f32.gmra.mrb[2].mxu0 %v10652_v41 }
  0x6d   :  { %9500 = vmatprep.mubr.f32.mxu0 %v10698_v63 }
  0x6e   :  { %9618 = vmatmul.mubr.f32.gmra.mrb[2].mxu1 %v10654_v42 }
  0x6f   :  { %9620 = vmatprep.mubr.f32.mxu1 %v10709_v25 }
  0x70   :  { %9501 = vmatmul.mubr.f32.gmra.mrb[4].mxu0 %v10743_v4 }
  0x71   :  { %9503 = vmatprep.mubr.f32.mxu0 %v10774_v58 }
  0x72   :  { %9621 = vmatmul.mubr.f32.gmra.mrb[4].mxu1 %v10772_v24 }
  0x73   :  { %9623 = vmatprep.mubr.f32.mxu1 %v10790_v34 }
  0x74   :  { %9504 = vmatmul.mubr.f32.gmra.mrb[6].mxu0 %v10812_v53 }
  0x75   :  { %9628 = vmatprep.mubr.msk.f32.mxu0 %vm10493_vm1, %v10492_v15 }
  0x76   :  { %9624 = vmatmul.mubr.f32.gmra.mrb[6].mxu1 %v10836_v55 }
  0x77   :  { %9658 = vmatprep.mubr.msk.f32.mxu1 %vm10493_vm1, %v10492_v15 }
  0xad   :  { %v1748_v16 = vpop.xlane.xlu1 %1747 }
  0xae   :  { %v1770_v4 = vmul.f32 0.5, %v1748_v16 }
  0xaf   :  { %v850_v17 = vpop.xlane.xlu0 %849 }
  0xb0   :  { %v872_v53 = vmul.f32 0.5, %v850_v17 }
  0xbe   :  { %v1751_v22 = vpop.xlane.xlu1 %1750 }
  0xbf   :  { %v853_v23 = vpop.xlane.xlu0 %852  ;;  %v1771_v25 = vmul.f32 0.5, %v1751_v22  ;;  %v11065_v22 = vand.u32 127, %v1818_v59 }
  0xc0   :  { %v873_v63 = vmul.f32 0.5, %v853_v23 }
  0xc1   :  { %vm1820_vm2 = vcmp.lt.s32.totalorder %v11065_v22, 110 }
  0xc2   :  { %v11033_v28 = vpop.xlane.xlu1 %858 }
  0xc3   :  { %v11035_v29 = vpop.xlane.xlu0 %855 }
  0xce   :  { %v11037_v34 = vpop.xlane.xlu1 %1756 }
  0xcf   :  { %v11039_v40 = vpop.xlane.xlu0 %1753 }
  0xd2   :  { %v11041_v41 = vpop.xlane.xlu1 %864 }
  0xd3   :  { %v11043_v42 = vpop.xlane.xlu0 %861 }
  0xde   :  { %v1763_v58 = vpop.xlane.xlu1 %1762 }
  0xdf   :  { %v1760_v24 = vpop.xlane.xlu0 %1759  ;;  %v1775_v46 = vmul.f32 0.5, %v1763_v58 }
  0xe0   :  { %v1774_v1 = vmul.f32 0.5, %v1760_v24 }
  0xe2   :  { %v11045_v39 = vpop.xlane.xlu1 %870 }
  0xe3   :  { %v11047_v33 = vpop.xlane.xlu0 %867 }
  0xeb   :  { %v1769_v26 = vpop.xlane.xlu1 %1768 }
  0xec   :  { %v1777_v36 = vmul.f32 0.5, %v1769_v26  ;;  %v874_v26 = vmul.f32 0.5, %v11035_v29 }
  0xed   :  { %v1766_v2 = vpop.xlane.xlu0 %1765 }
  0xee   :  { %v1776_v44 = vmul.f32 0.5, %v1766_v2 }
 0x13b   :  { %v9496_v55 = vpop.f32.mrb[0].mxu0 }
 0x13c   :  { %v881_v62 = vsub.f32 %v9496_v55, %v873_v63  ;;  %v794_v32 = vpop.f32.mrb[1].mxu0 }
 0x13d   :  { %v9616_v14 = vpop.f32.mrb[0].mxu1  ;;  %v880_v8 = vsub.f32 %v794_v32, %v872_v53 }
 0x13e   :  { %v890_v5 = vmul.f32 1.442695, %v881_v62  ;;  %v1779_v6 = vsub.f32 %v9616_v14, %v1771_v25  ;;  %v1692_v21 = vpop.f32.mrb[1].mxu1 }
 0x13f   :  { %v888_v19 = vmul.f32 1.442695, %v880_v8  ;;  %v1778_v43 = vsub.f32 %v1692_v21, %v1770_v4  ;;  %v11049_v60 = vpop.f32.mrb[2].mxu0 }
 0x140   :  { %10444 = vpow2.f32 %v890_v5  ;;  %v1788_v54 = vmul.f32 1.442695, %v1779_v6  ;;  %v11051_v52 = vpop.f32.mrb[3].mxu0  ;;  %v1773_v5 = vmul.f32 0.5, %v11037_v34 }
 0x141   :  { %10446 = vpow2.f32 %v888_v19  ;;  %v1786_v38 = vmul.f32 1.442695, %v1778_v43  ;;  %v11053_v0 = vpop.f32.mrb[2].mxu1  ;;  %v875_v19 = vmul.f32 0.5, %v11033_v28  ;;  %v1772_v43 = vmul.f32 0.5, %v11039_v40 }
 0x142   :  { %10448 = vpow2.f32 %v1788_v54  ;;  %v11055_v7 = vpop.f32.mrb[3].mxu1  ;;  %v1781_v28 = vsub.f32 %v11053_v0, %v1773_v5 }
 0x143   :  { %10450 = vpow2.f32 %v1786_v38  ;;  %v11057_v56 = vpop.f32.mrb[4].mxu0 }
 0x144   :  { %v11059_v10 = vpop.f32.mrb[5].mxu0 }
 0x145   :  { %v9622_v27 = vpop.f32.mrb[4].mxu1 }
 0x146   :  { %v1783_v30 = vsub.f32 %v9622_v27, %v1775_v46  ;;  %v1716_v37 = vpop.f32.mrb[5].mxu1 }
 0x147   :  { %v1782_v48 = vsub.f32 %v1716_v37, %v1774_v1  ;;  %v11061_v9 = vpop.f32.mrb[6].mxu0 }
 0x148   :  { %v1796_v51 = vmul.f32 1.442695, %v1783_v30  ;;  %v11063_v49 = vpop.f32.mrb[7].mxu0 }
 0x149   :  { %v1794_v13 = vmul.f32 1.442695, %v1782_v48  ;;  %v9625_v31 = vpop.f32.mrb[6].mxu1  ;;  %v883_v48 = vsub.f32 %v11049_v60, %v875_v19  ;;  %v882_v60 = vsub.f32 %v11051_v52, %v874_v26 }
 0x14a   :  { %v10445_v12 = vpop.eup %10444  ;;  %10452 = vpow2.f32 %v1796_v51  ;;  %v1785_v50 = vsub.f32 %v9625_v31, %v1777_v36  ;;  %v1728_v3 = vpop.f32.mrb[7].mxu1 }
 0x14b   :  { %v10447_v20 = vpop.eup %10446  ;;  %v905_v45 = vadd.f32 0.0001, %v10445_v12  ;;  %10454 = vpow2.f32 %v1794_v13  ;;  %v1784_v35 = vsub.f32 %v1728_v3, %v1776_v44  ;;  %v1780_v44 = vsub.f32 %v11055_v7, %v1772_v43 }
 0x14c   :  { %v10449_v61 = vpop.eup %10448  ;;  %v904_v18 = vadd.f32 0.0001, %v10447_v20  ;;  %v1800_v57 = vmul.f32 1.442695, %v1785_v50  ;;  %v1792_v50 = vmul.f32 1.442695, %v1781_v28 }
 0x14d   :  { %v10451_v47 = vpop.eup %10450  ;;  %v913_v11 = vmul.f32 0.09534626, %v905_v45  ;;  %v1803_v16 = vadd.f32 0.0001, %v10449_v61  ;;  %v1798_v17 = vmul.f32 1.442695, %v1784_v35 }
 0x14e   :  { %v912_v23 = vmul.f32 0.09534626, %v904_v18  ;;  %10456 = vpow2.f32 %v1800_v57  ;;  %v1802_v63 = vadd.f32 0.0001, %v10451_v47  ;;  %v1790_v45 = vmul.f32 1.442695, %v1780_v44 }
 0x14f   :  { %v11067_v58 = vand.u32 4294901760, %v913_v11  ;;  %10458 = vpow2.f32 %v1798_v17  ;;  %v1811_v4 = vmul.f32 0.09534626, %v1803_v16  ;;  %v894_v52 = vmul.f32 1.442695, %v883_v48 }
 0x150   :  { %v11069_v24 = vand.u32 4294901760, %v912_v23  ;;  %v1810_v62 = vmul.f32 0.09534626, %v1802_v63  ;;  %v892_v57 = vmul.f32 1.442695, %v882_v60  ;;  %10460 = vpow2.f32 %v1792_v50 }
 0x151   :  { %v11072_v25 = vsub.f32 %v913_v11, %v11067_v58  ;;  %v1822_v21 = vsel %vm1820_vm2, %v1811_v4, 0.0  ;;  %10462 = vpow2.f32 %v1790_v45  ;;  %v877_v28 = vmul.f32 0.5, %v11041_v41 }
 0x152   :  { %v11076_v53 = vsub.f32 %v912_v23, %v11069_v24  ;;  %v1821_v46 = vsel %vm1820_vm2, %v1810_v62, 0.0  ;;  %v11094_v27 = vand.u32 4294901760, %v1822_v21  ;;  %10464 = vpow2.f32 %v894_v52 }
 0x153   :  { %v2351_v55 = vand.u32 4294901760, %v11072_v25  ;;  %v11104_v29 = vand.u32 4294901760, %v1821_v46  ;;  %10466 = vpow2.f32 %v892_v57 }
 0x154   :  { %v10453_v32 = vpop.eup %10452  ;;  %v1905_v14 = vand.u32 4294901760, %v11076_v53  ;;  %9657 = vmatpush3.xpose.msra.mxu1 %v11094_v27  ;;  %v2361_v7 = vsub.f32 %v1822_v21, %v11094_v27 }
 0x155   :  { %v10455_v8 = vpop.eup %10454  ;;  %v2352_v6 = vsub.f32 %v11072_v25, %v2351_v55  ;;  %v1807_v54 = vadd.f32 0.0001, %v10453_v32  ;;  %9661 = vmatprep.subr.mxu1 %v10492_v15  ;;  %9627 = vmatpush3.xpose.msra.mxu0 %v11104_v29  ;;  %v1915_v59 = vsub.f32 %v1821_v46, %v11104_v29 }
 0x156   :  { %v1906_v38 = vsub.f32 %v11076_v53, %v1905_v14  ;;  %v1806_v34 = vadd.f32 0.0001, %v10455_v8  ;;  %9631 = vmatprep.subr.mxu0 %v10492_v15  ;;  %v2362_v35 = vand.u32 4294901760, %v2361_v7 }
 0x157   :  { %v1815_v2 = vmul.f32 0.09534626, %v1807_v54  ;;  %v2353_v37 = vand.u32 4294901760, %v2352_v6  ;;  %v1916_v61 = vand.u32 4294901760, %v1915_v59 }
 0x158   :  { %v10457_v1 = vpop.eup %10456  ;;  %v1814_v40 = vmul.f32 0.09534626, %v1806_v34  ;;  %v1907_v13 = vand.u32 4294901760, %v1906_v38  ;;  %v2363_v47 = vsub.f32 %v2361_v7, %v2362_v35 }
 0x159   :  { %v10459_v30 = vpop.eup %10458  ;;  %v1809_v36 = vadd.f32 0.0001, %v10457_v1  ;;  %v11101_v51 = vsel %vm1820_vm2, %v1815_v2, 0.0  ;;  %9659 = vmatmul.mubr.f32.vlgmr.msra.gmra.mrb[8].mxu1 %v2353_v37  ;;  %v1917_v11 = vsub.f32 %v1915_v59, %v1916_v61 }
 0x15a   :  { %v11108_v31 = vsel %vm1820_vm2, %v1814_v40, 0.0  ;;  %v1808_v12 = vadd.f32 0.0001, %v10459_v30  ;;  %9663 = vmatprep.mubr.msk.f32.mxu1 %vm10493_vm1, %v10492_v15  ;;  %9629 = vmatmul.mubr.f32.vlgmr.msra.gmra.mrb[8].mxu0 %v1907_v13  ;;  %v2364_v16 = vand.u32 4294901760, %v2363_v47  ;;  %v10461_v23 = vpop.eup %10460  ;;  %v876_v40 = vmul.f32 0.5, %v11043_v42 }
 0x15b   :  { %v1817_v0 = vmul.f32 0.09534626, %v1809_v36  ;;  %9633 = vmatprep.mubr.msk.f32.mxu0 %vm10493_vm1, %v10492_v15  ;;  %v1918_v17 = vand.u32 4294901760, %v1917_v11  ;;  %v10463_v63 = vpop.eup %10462  ;;  %v1805_v32 = vadd.f32 0.0001, %v10461_v23  ;;  %v885_v13 = vsub.f32 %v11057_v56, %v877_v28 }
 0x15c   :  { %v1816_v20 = vmul.f32 0.09534626, %v1808_v12  ;;  %9662 = vmatpush3.xpose.msra.mxu1 %v2364_v16  ;;  %v10465_v4 = vpop.eup %10464  ;;  %v1804_v8 = vadd.f32 0.0001, %v10463_v63  ;;  %v11254_v52 = vand.u32 4294901760, %v11108_v31  ;;  %v879_v63 = vmul.f32 0.5, %v11045_v39 }
 0x15d   :  { %v11117_v3 = vsel %vm1820_vm2, %v1817_v0, 0.0  ;;  %9632 = vmatpush3.xpose.msra.mxu0 %v1918_v17  ;;  %9666 = vmatprep.subr.mxu1 %v10492_v15  ;;  %v10467_v62 = vpop.eup %10466  ;;  %v907_v5 = vadd.f32 0.0001, %v10465_v4  ;;  %v1813_v21 = vmul.f32 0.09534626, %v1805_v32  ;;  %v884_v0 = vsub.f32 %v11059_v10, %v876_v40 }
 0x15e   :  { %v11124_v18 = vsel %vm1820_vm2, %v1816_v20, 0.0  ;;  %9636 = vmatprep.subr.mxu0 %v10492_v15  ;;  %v906_v6 = vadd.f32 0.0001, %v10467_v62  ;;  %v1812_v19 = vmul.f32 0.09534626, %v1804_v8  ;;  %v11268_v16 = vsub.f32 %v11108_v31, %v11254_v52 }
 0x15f   :  { %v915_v43 = vmul.f32 0.09534626, %v907_v5  ;;  %v1824_v38 = vsel %vm1820_vm2, %v1813_v21, 0.0  ;;  %v896_v10 = vmul.f32 1.442695, %v884_v0  ;;  %v878_v4 = vmul.f32 0.5, %v11047_v33 }
 0x160   :  { %v914_v54 = vmul.f32 0.09534626, %v906_v6  ;;  %v1823_v46 = vsel %vm1820_vm2, %v1812_v19, 0.0  ;;  %v11166_v22 = vand.u32 4294901760, %v1824_v38  ;;  %v3700_v23 = vand.u32 4294901760, %v11268_v16 }
 0x161   :  { %9664 = vmatmul.mubr.f32.vlgmr.msra.gmra.mrb[8].mxu1 %v11067_v58  ;;  %v11156_v34 = vand.u32 4294901760, %v915_v43  ;;  %v887_v6 = vsub.f32 %v11061_v9, %v879_v63  ;;  %v886_v21 = vsub.f32 %v11063_v49, %v878_v4 }
 0x162   :  { %9634 = vmatmul.mubr.f32.vlgmr.msra.gmra.mrb[8].mxu0 %v11069_v24  ;;  %9667 = vmatpush3.xpose.msra.mxu1 %v2361_v7  ;;  %v11158_v1 = vand.u32 4294901760, %v914_v54  ;;  %v3701_v5 = vsub.f32 %v11268_v16, %v3700_v23 }
 0x163   :  { %9637 = vmatpush3.xpose.msra.mxu0 %v1915_v59  ;;  %9668 = vmatprep.mubr.msk.f32.mxu1 %vm10493_vm1, %v10492_v15  ;;  %v900_v49 = vmul.f32 1.442695, %v886_v21  ;;  %v1832_v21 = vld [vmem:[%s11765_s2 + $0x18] sm:$0xff] }
 0x164   :  { %9671 = vmatprep.subr.mxu1 %v10492_v15  ;;  %9638 = vmatprep.mubr.msk.f32.mxu0 %vm10493_vm1, %v10492_v15  ;;  %v3702_v19 = vand.u32 4294901760, %v3701_v5 }
 0x165   :  { %9641 = vmatprep.subr.mxu0 %v10492_v15 }
 0x169   :  { %9669 = vmatmul.mubr.f32.vlgmr.msra.gmra.mrb[8].mxu1 %v11072_v25  ;;  %v11168_v25 = vand.u32 4294901760, %v1823_v46 }
 0x16a   :  { %9639 = vmatmul.mubr.f32.vlgmr.msra.gmra.mrb[8].mxu0 %v11076_v53  ;;  %9672 = vmatpush3.xpose.msra.mxu1 %v11094_v27  ;;  %v11171_v53 = vsub.f32 %v915_v43, %v11156_v34  ;;  %v902_v43 = vmul.f32 1.442695, %v887_v6 }
 0x16b   :  { %9642 = vmatpush3.xpose.msra.mxu0 %v11104_v29  ;;  %9673 = vmatprep.mubr.msk.f32.mxu1 %vm10493_vm1, %v10492_v15  ;;  %v11180_v26 = vsub.f32 %v1823_v46, %v11168_v25 }
 0x16c   :  { %9676 = vmatprep.subr.mxu1 %v10492_v15  ;;  %9643 = vmatprep.mubr.msk.f32.mxu0 %vm10493_vm1, %v10492_v15  ;;  %v3243_v2 = vand.u32 4294901760, %v11171_v53 }
 0x16d   :  { %9646 = vmatprep.subr.mxu0 %v10492_v15 }
 0x16e   :  { %v3244_v36 = vsub.f32 %v11171_v53, %v3243_v2 }
 0x170   :  { %v3245_v41 = vand.u32 4294901760, %v3244_v36 }
 0x171   :  { %9674 = vmatmul.mubr.f32.vlgmr.msra.gmra.mrb[8].mxu1 %v2351_v55  ;;  %v11174_v55 = vsub.f32 %v914_v54, %v11158_v1 }
 0x172   :  { %9644 = vmatmul.mubr.f32.vlgmr.msra.gmra.mrb[8].mxu0 %v1905_v14  ;;  %9677 = vmatpush3.xpose.msra.mxu1 %v2362_v35  ;;  %v11177_v14 = vsub.f32 %v1824_v38, %v11166_v22 }
 0x173   :  { %9647 = vmatpush3.xpose.msra.mxu0 %v1916_v61  ;;  %9678 = vmatprep.mubr.msk.f32.mxu1 %vm10493_vm1, %v10492_v15  ;;  %v2797_v30 = vand.u32 4294901760, %v11174_v55  ;;  %v11251_v61 = vand.u32 4294901760, %v11101_v51 }
 0x174   :  { %9681 = vmatprep.subr.mxu1 %v10492_v15  ;;  %9648 = vmatprep.mubr.msk.f32.mxu0 %vm10493_vm1, %v10492_v15  ;;  %v3254_v37 = vand.u32 4294901760, %v11177_v14 }
 0x175   :  { %9651 = vmatprep.subr.mxu0 %v10492_v15  ;;  %v2798_v48 = vsub.f32 %v11174_v55, %v2797_v30  ;;  %v11264_v11 = vsub.f32 %v11101_v51, %v11251_v61 }
 0x176   :  { %v3255_v44 = vsub.f32 %v11177_v14, %v3254_v37 }
 0x177   :  { %v2799_v42 = vand.u32 4294901760, %v2798_v48  ;;  %v4146_v31 = vand.u32 4294901760, %v11264_v11 }
 0x178   :  { %v3256_v56 = vand.u32 4294901760, %v3255_v44 }
 0x179   :  { %9679 = vmatmul.mubr.f32.vlgmr.msra.gmra.mrb[8].mxu1 %v11067_v58  ;;  %v4147_v8 = vsub.f32 %v11264_v11, %v4146_v31 }
 0x17a   :  { %9649 = vmatmul.mubr.f32.vlgmr.msra.gmra.mrb[8].mxu0 %v11069_v24  ;;  %9682 = vmatpush3.xpose.msra.mxu1 %v11094_v27  ;;  %v2808_v27 = vand.u32 4294901760, %v11180_v26 }
 0x17b   :  { %9652 = vmatpush3.xpose.msra.mxu0 %v11104_v29  ;;  %9683 = vmatprep.mubr.msk.f32.mxu1 %vm10493_vm1, %v10492_v15  ;;  %v4148_v9 = vand.u32 4294901760, %v4147_v8 }
 0x17c   :  { %9716 = vmatprep.subr.mxu1 %v10492_v15  ;;  %9653 = vmatprep.mubr.msk.f32.mxu0 %vm10493_vm1, %v10492_v15  ;;  %v2809_v29 = vsub.f32 %v11180_v26, %v2808_v27 }
 0x17d   :  { %9686 = vmatprep.subr.mxu0 %v10492_v15 }
 0x181   :  { %9684 = vmatmul.mubr.f32.vlgmr.msra.gmra.mrb[8].mxu1 %v11067_v58  ;;  %v2810_v58 = vand.u32 4294901760, %v2809_v29 }
 0x182   :  { %9654 = vmatmul.mubr.f32.vlgmr.msra.gmra.mrb[8].mxu0 %v11069_v24  ;;  %9717 = vmatpush3.xpose.msra.mxu1 %v11166_v22  ;;  %v898_v24 = vmul.f32 1.442695, %v885_v13 }
 0x183   :  { %9687 = vmatpush3.xpose.msra.mxu0 %v11168_v25  ;;  %9718 = vmatprep.mubr.msk.f32.mxu1 %vm10493_vm1, %v10492_v15 }
 0x184   :  { %9721 = vmatprep.subr.mxu1 %v10492_v15  ;;  %9688 = vmatprep.mubr.msk.f32.mxu0 %vm10493_vm1, %v10492_v15  ;;  %10468 = vpow2.f32 %v898_v24 }
 0x185   :  { %9691 = vmatprep.subr.mxu0 %v10492_v15  ;;  %9719 = vmatmul.mubr.f32.vlgmr.msra.gmra.mrb[10].mxu1 %v3245_v41  ;;  %10470 = vpow2.f32 %v896_v10 }
 0x186   :  { %9689 = vmatmul.mubr.f32.vlgmr.msra.gmra.mrb[10].mxu0 %v2799_v42  ;;  %9722 = vmatpush3.xpose.msra.mxu1 %v3256_v56  ;;  %10472 = vpow2.f32 %v902_v43  ;;  %v1830_v42 = vld [vmem:[%s11765_s2 + $0x8] sm:$0xff]  ;;  %v1829_v56 = vld [vmem:[%s11765_s2] sm:$0xff] }
 0x187   :  { %9692 = vmatpush3.xpose.msra.mxu0 %v2810_v58  ;;  %9723 = vmatprep.mubr.msk.f32.mxu1 %vm10493_vm1, %v10492_v15  ;;  %10474 = vpow2.f32 %v900_v49  ;;  %v11414_v58 = vand.u32 4294901760, %v1830_v42  ;;  %v11416_v24 = vand.u32 4294901760, %v1829_v56 }
 0x188   :  { %9726 = vmatprep.subr.mxu1 %v10492_v15  ;;  %9693 = vmatprep.mubr.msk.f32.mxu0 %vm10493_vm1, %v10492_v15 }
 0x189   :  { %9696 = vmatprep.subr.mxu0 %v10492_v15  ;;  %v5960_v10 = vsub.f32 %v1830_v42, %v11414_v58 }
 0x18d   :  { %9724 = vmatmul.mubr.f32.vlgmr.msra.gmra.mrb[10].mxu1 %v11156_v34 }
 0x18e   :  { %9694 = vmatmul.mubr.f32.vlgmr.msra.gmra.mrb[10].mxu0 %v11158_v1  ;;  %9727 = vmatpush3.xpose.msra.mxu1 %v11177_v14  ;;  %v10469_v12 = vpop.eup %10468  ;;  %v11342_v14 = vand.u32 4294901760, %v11124_v18 }
 0x18f   :  { %9697 = vmatpush3.xpose.msra.mxu0 %v11180_v26  ;;  %9728 = vmatprep.mubr.msk.f32.mxu1 %vm10493_vm1, %v10492_v15  ;;  %v10471_v60 = vpop.eup %10470  ;;  %v909_v7 = vadd.f32 0.0001, %v10469_v12  ;;  %v5511_v12 = vsub.f32 %v1829_v56, %v11416_v24 }
 0x190   :  { %9731 = vmatprep.subr.mxu1 %v10492_v15  ;;  %9698 = vmatprep.mubr.msk.f32.mxu0 %vm10493_vm1, %v10492_v15  ;;  %v908_v59 = vadd.f32 0.0001, %v10471_v60  ;;  %v10473_v54 = vpop.eup %10472 }
 0x191   :  { %9701 = vmatprep.subr.mxu0 %v10492_v15  ;;  %v917_v50 = vmul.f32 0.09534626, %v909_v7  ;;  %v10475_v38 = vpop.eup %10474  ;;  %v911_v46 = vadd.f32 0.0001, %v10473_v54 }
 0x192   :  { %v916_v20 = vmul.f32 0.09534626, %v908_v59  ;;  %v5961_v59 = vand.u32 4294901760, %v5960_v10 }
 0x193   :  { %v11240_v45 = vand.u32 4294901760, %v917_v50 }
 0x194   :  { %v11242_v35 = vand.u32 4294901760, %v916_v20 }
 0x195   :  { %9729 = vmatmul.mubr.f32.vlgmr.msra.gmra.mrb[10].mxu1 %v11171_v53  ;;  %v11257_v57 = vsub.f32 %v917_v50, %v11240_v45 }
 0x196   :  { %9699 = vmatmul.mubr.f32.vlgmr.msra.gmra.mrb[10].mxu0 %v11174_v55  ;;  %9732 = vmatpush3.xpose.msra.mxu1 %v11166_v22  ;;  %v11260_v47 = vsub.f32 %v916_v20, %v11242_v35  ;;  %v11339_v55 = vand.u32 4294901760, %v11117_v3 }
 0x197   :  { %9702 = vmatpush3.xpose.msra.mxu0 %v11168_v25  ;;  %9733 = vmatprep.mubr.msk.f32.mxu1 %vm10493_vm1, %v10492_v15  ;;  %v4135_v51 = vand.u32 4294901760, %v11257_v57 }
 0x198   :  { %9736 = vmatprep.subr.mxu1 %v10492_v15  ;;  %9703 = vmatprep.mubr.msk.f32.mxu0 %vm10493_vm1, %v10492_v15  ;;  %v3689_v17 = vand.u32 4294901760, %v11260_v47 }
 0x199   :  { %9706 = vmatprep.subr.mxu0 %v10492_v15  ;;  %v4136_v62 = vsub.f32 %v11257_v57, %v4135_v51 }
 0x19a   :  { %v3690_v32 = vsub.f32 %v11260_v47, %v3689_v17 }
 0x19b   :  { %v4137_v39 = vand.u32 4294901760, %v4136_v62 }
 0x19c   :  { %v3691_v33 = vand.u32 4294901760, %v3690_v32 }
 0x19d   :  { %9734 = vmatmul.mubr.f32.vlgmr.msra.gmra.mrb[10].mxu1 %v3243_v2 }
 0x19e   :  { %9704 = vmatmul.mubr.f32.vlgmr.msra.gmra.mrb[10].mxu0 %v2797_v30  ;;  %9737 = vmatpush3.xpose.msra.mxu1 %v3254_v37  ;;  %v5037_v30 = vsub.f32 %v11117_v3, %v11339_v55  ;;  %v4591_v37 = vsub.f32 %v11124_v18, %v11342_v14 }
 0x19f   :  { %9707 = vmatpush3.xpose.msra.mxu0 %v2808_v27  ;;  %9738 = vmatprep.mubr.msk.f32.mxu1 %vm10493_vm1, %v10492_v15 }
 0x1a0   :  { %9741 = vmatprep.subr.mxu1 %v10492_v15  ;;  %9708 = vmatprep.mubr.msk.f32.mxu0 %vm10493_vm1, %v10492_v15  ;;  %v5038_v3 = vand.u32 4294901760, %v5037_v30  ;;  %v4592_v18 = vand.u32 4294901760, %v4591_v37 }
 0x1a1   :  { %9711 = vmatprep.subr.mxu0 %v10492_v15 }
 0x1a2   :  { %v5039_v48 = vsub.f32 %v5037_v30, %v5038_v3  ;;  %v4593_v44 = vsub.f32 %v4591_v37, %v4592_v18 }
 0x1a4   :  { %v5040_v0 = vand.u32 4294901760, %v5039_v48  ;;  %v4594_v41 = vand.u32 4294901760, %v4593_v44 }
 0x1a5   :  { %9739 = vmatmul.mubr.f32.vlgmr.msra.gmra.mrb[10].mxu1 %v11156_v34 }
 0x1a6   :  { %9709 = vmatmul.mubr.f32.vlgmr.msra.gmra.mrb[10].mxu0 %v11158_v1  ;;  %9742 = vmatpush3.xpose.msra.mxu1 %v11166_v22 }
 0x1a7   :  { %9712 = vmatpush3.xpose.msra.mxu0 %v11168_v25  ;;  %9743 = vmatprep.mubr.msk.f32.mxu1 %vm10493_vm1, %v10492_v15 }
 0x1a8   :  { %9776 = vmatprep.subr.mxu1 %v10492_v15  ;;  %9713 = vmatprep.mubr.msk.f32.mxu0 %vm10493_vm1, %v10492_v15 }
 0x1a9   :  { %9746 = vmatprep.subr.mxu0 %v10492_v15 }
 0x1ad   :  { %9744 = vmatmul.mubr.f32.vlgmr.msra.gmra.mrb[10].mxu1 %v11156_v34  ;;  %v910_v34 = vadd.f32 0.0001, %v10475_v38 }
 0x1ae   :  { %9714 = vmatmul.mubr.f32.vlgmr.msra.gmra.mrb[10].mxu0 %v11158_v1  ;;  %9777 = vmatpush3.xpose.msra.mxu1 %v11251_v61  ;;  %v919_v1 = vmul.f32 0.09534626, %v911_v46 }
 0x1af   :  { %9747 = vmatpush3.xpose.msra.mxu0 %v11254_v52  ;;  %9778 = vmatprep.mubr.msk.f32.mxu1 %vm10493_vm1, %v10492_v15  ;;  %v918_v22 = vmul.f32 0.09534626, %v910_v34 }
 0x1b0   :  { %9781 = vmatprep.subr.mxu1 %v10492_v15  ;;  %9748 = vmatprep.mubr.msk.f32.mxu0 %vm10493_vm1, %v10492_v15  ;;  %v11328_v25 = vand.u32 4294901760, %v919_v1 }
 0x1b1   :  { %9751 = vmatprep.subr.mxu0 %v10492_v15  ;;  %9779 = vmatmul.mubr.f32.vlgmr.msra.gmra.mrb[12].mxu1 %v4137_v39  ;;  %v11330_v53 = vand.u32 4294901760, %v918_v22  ;;  %v1831_v39 = vld [vmem:[%s11765_s2 + $0x10] sm:$0xff] }
 0x1b2   :  { %9749 = vmatmul.mubr.f32.vlgmr.msra.gmra.mrb[12].mxu0 %v3691_v33  ;;  %9782 = vmatpush3.xpose.msra.mxu1 %v4148_v9  ;;  %v5026_v26 = vsub.f32 %v919_v1, %v11328_v25  ;;  %v11468_v33 = vand.u32 4294901760, %v1832_v21  ;;  %v11474_v9 = vand.u32 4294901760, %v1831_v39 }
 0x1b3   :  { %9752 = vmatpush3.xpose.msra.mxu0 %v3702_v19  ;;  %9783 = vmatprep.mubr.msk.f32.mxu1 %vm10493_vm1, %v10492_v15  ;;  %v4580_v2 = vsub.f32 %v918_v22, %v11330_v53 }
 0x1b4   :  { %9786 = vmatprep.subr.mxu1 %v10492_v15  ;;  %9753 = vmatprep.mubr.msk.f32.mxu0 %vm10493_vm1, %v10492_v15  ;;  %v5027_v27 = vand.u32 4294901760, %v5026_v26  ;;  %v11479_v19 = vsub.f32 %v1832_v21, %v11468_v33  ;;  %v11482_v43 = vsub.f32 %v1831_v39, %v11474_v9 }
 0x1b5   :  { %9756 = vmatprep.subr.mxu0 %v10492_v15  ;;  %v4581_v28 = vand.u32 4294901760, %v4580_v2 }
 0x1b6   :  { %v5028_v40 = vsub.f32 %v5026_v26, %v5027_v27  ;;  %v6859_v38 = vand.u32 4294901760, %v11479_v19 }
 0x1b7   :  { %v4582_v36 = vsub.f32 %v4580_v2, %v4581_v28 }
 0x1b8   :  { %v5029_v29 = vand.u32 4294901760, %v5028_v40 }
 0x1b9   :  { %9784 = vmatmul.mubr.f32.vlgmr.msra.gmra.mrb[12].mxu1 %v11240_v45  ;;  %v4583_v13 = vand.u32 4294901760, %v4582_v36 }
 0x1ba   :  { %9754 = vmatmul.mubr.f32.vlgmr.msra.gmra.mrb[12].mxu0 %v11242_v35  ;;  %9787 = vmatpush3.xpose.msra.mxu1 %v11264_v11  ;;  %v5512_v11 = vand.u32 4294901760, %v5511_v12 }
 0x1bb   :  { %9757 = vmatpush3.xpose.msra.mxu0 %v11268_v16  ;;  %9788 = vmatprep.mubr.msk.f32.mxu1 %vm10493_vm1, %v10492_v15 }
 0x1bc   :  { %9791 = vmatprep.subr.mxu1 %v10492_v15  ;;  %9758 = vmatprep.mubr.msk.f32.mxu0 %vm10493_vm1, %v10492_v15  ;;  %v5513_v63 = vsub.f32 %v5511_v12, %v5512_v11 }
 0x1bd   :  { %9761 = vmatprep.subr.mxu0 %v10492_v15 }
 0x1be   :  { %v5514_v6 = vand.u32 4294901760, %v5513_v63 }
 0x1c1   :  { %9789 = vmatmul.mubr.f32.vlgmr.msra.gmra.mrb[12].mxu1 %v11257_v57 }
 0x1c2   :  { %9759 = vmatmul.mubr.f32.vlgmr.msra.gmra.mrb[12].mxu0 %v11260_v47  ;;  %9792 = vmatpush3.xpose.msra.mxu1 %v11251_v61 }
 0x1c3   :  { %9762 = vmatpush3.xpose.msra.mxu0 %v11254_v52  ;;  %9793 = vmatprep.mubr.msk.f32.mxu1 %vm10493_vm1, %v10492_v15 }
 0x1c4   :  { %9796 = vmatprep.subr.mxu1 %v10492_v15  ;;  %9763 = vmatprep.mubr.msk.f32.mxu0 %vm10493_vm1, %v10492_v15 }
 0x1c5   :  { %9766 = vmatprep.subr.mxu0 %v10492_v15 }
 0x1c9   :  { %9794 = vmatmul.mubr.f32.vlgmr.msra.gmra.mrb[12].mxu1 %v4135_v51 }
 0x1ca   :  { %9764 = vmatmul.mubr.f32.vlgmr.msra.gmra.mrb[12].mxu0 %v3689_v17  ;;  %9797 = vmatpush3.xpose.msra.mxu1 %v4146_v31  ;;  %v5962_v17 = vsub.f32 %v5960_v10, %v5961_v59 }
 0x1cb   :  { %9767 = vmatpush3.xpose.msra.mxu0 %v3700_v23  ;;  %9798 = vmatprep.mubr.msk.f32.mxu1 %vm10493_vm1, %v10492_v15 }
 0x1cc   :  { %9801 = vmatprep.subr.mxu1 %v10492_v15  ;;  %9768 = vmatprep.mubr.msk.f32.mxu0 %vm10493_vm1, %v10492_v15  ;;  %v5963_v32 = vand.u32 4294901760, %v5962_v17 }
 0x1cd   :  { %9771 = vmatprep.subr.mxu0 %v10492_v15 }
 0x1d1   :  { %9799 = vmatmul.mubr.f32.vlgmr.msra.gmra.mrb[12].mxu1 %v11240_v45 }
 0x1d2   :  { %9769 = vmatmul.mubr.f32.vlgmr.msra.gmra.mrb[12].mxu0 %v11242_v35  ;;  %9802 = vmatpush3.xpose.msra.mxu1 %v11251_v61 }
 0x1d3   :  { %9772 = vmatpush3.xpose.msra.mxu0 %v11254_v52  ;;  %9803 = vmatprep.mubr.msk.f32.mxu1 %vm10493_vm1, %v10492_v15 }
 0x1d4   :  { %9836 = vmatprep.subr.mxu1 %v10492_v15  ;;  %9773 = vmatprep.mubr.msk.f32.mxu0 %vm10493_vm1, %v10492_v15 }
 0x1d5   :  { %9806 = vmatprep.subr.mxu0 %v10492_v15 }
 0x1d9   :  { %9804 = vmatmul.mubr.f32.vlgmr.msra.gmra.mrb[12].mxu1 %v11240_v45 }
 0x1da   :  { %9774 = vmatmul.mubr.f32.vlgmr.msra.gmra.mrb[12].mxu0 %v11242_v35  ;;  %9837 = vmatpush3.xpose.msra.mxu1 %v11339_v55 }
 0x1db   :  { %9807 = vmatpush3.xpose.msra.mxu0 %v11342_v14  ;;  %9838 = vmatprep.mubr.msk.f32.mxu1 %vm10493_vm1, %v10492_v15 }
 0x1dc   :  { %9841 = vmatprep.subr.mxu1 %v10492_v15  ;;  %9808 = vmatprep.mubr.msk.f32.mxu0 %vm10493_vm1, %v10492_v15 }
 0x1dd   :  { %9811 = vmatprep.subr.mxu0 %v10492_v15  ;;  %9839 = vmatmul.mubr.f32.vlgmr.msra.gmra.mrb[14].mxu1 %v5029_v29 }
 0x1de   :  { %9809 = vmatmul.mubr.f32.vlgmr.msra.gmra.mrb[14].mxu0 %v4583_v13  ;;  %9842 = vmatpush3.xpose.msra.mxu1 %v5040_v0  ;;  %v1834_v13 = vld [vmem:[%s11765_s2 + $0x28] sm:$0xff]  ;;  %v1833_v0 = vld [vmem:[%s11765_s2 + $0x20] sm:$0xff] }
 0x1df   :  { %9812 = vmatpush3.xpose.msra.mxu0 %v4594_v41  ;;  %9843 = vmatprep.mubr.msk.f32.mxu1 %vm10493_vm1, %v10492_v15  ;;  %v11550_v41 = vand.u32 4294901760, %v1834_v13  ;;  %v11558_v42 = vand.u32 4294901760, %v1833_v0 }
 0x1e0   :  { %9846 = vmatprep.subr.mxu1 %v10492_v15  ;;  %9813 = vmatprep.mubr.msk.f32.mxu0 %vm10493_vm1, %v10492_v15 }
 0x1e1   :  { %9816 = vmatprep.subr.mxu0 %v10492_v15  ;;  %v11563_v56 = vsub.f32 %v1834_v13, %v11550_v41 }
 0x1e5   :  { %9844 = vmatmul.mubr.f32.vlgmr.msra.gmra.mrb[14].mxu1 %v11328_v25 }
 0x1e6   :  { %9814 = vmatmul.mubr.f32.vlgmr.msra.gmra.mrb[14].mxu0 %v11330_v53  ;;  %9847 = vmatpush3.xpose.msra.mxu1 %v5037_v30 }
 0x1e7   :  { %9817 = vmatpush3.xpose.msra.mxu0 %v4591_v37  ;;  %9848 = vmatprep.mubr.msk.f32.mxu1 %vm10493_vm1, %v10492_v15  ;;  %v6860_v37 = vsub.f32 %v11479_v19, %v6859_v38 }
 0x1e8   :  { %9851 = vmatprep.subr.mxu1 %v10492_v15  ;;  %9818 = vmatprep.mubr.msk.f32.mxu0 %vm10493_vm1, %v10492_v15 }
 0x1e9   :  { %9821 = vmatprep.subr.mxu0 %v10492_v15  ;;  %v6861_v36 = vand.u32 4294901760, %v6860_v37 }
 0x1ed   :  { %9849 = vmatmul.mubr.f32.vlgmr.msra.gmra.mrb[14].mxu1 %v5026_v26  ;;  %v6410_v26 = vand.u32 4294901760, %v11482_v43 }
 0x1ee   :  { %9819 = vmatmul.mubr.f32.vlgmr.msra.gmra.mrb[14].mxu0 %v4580_v2  ;;  %9852 = vmatpush3.xpose.msra.mxu1 %v11339_v55 }
 0x1ef   :  { %9822 = vmatpush3.xpose.msra.mxu0 %v11342_v14  ;;  %9853 = vmatprep.mubr.msk.f32.mxu1 %vm10493_vm1, %v10492_v15 }
 0x1f0   :  { %9856 = vmatprep.subr.mxu1 %v10492_v15  ;;  %9823 = vmatprep.mubr.msk.f32.mxu0 %vm10493_vm1, %v10492_v15 }
 0x1f1   :  { %9826 = vmatprep.subr.mxu0 %v10492_v15 }
 0x1f5   :  { %9854 = vmatmul.mubr.f32.vlgmr.msra.gmra.mrb[14].mxu1 %v5027_v27 }
 0x1f6   :  { %9824 = vmatmul.mubr.f32.vlgmr.msra.gmra.mrb[14].mxu0 %v4581_v28  ;;  %9857 = vmatpush3.xpose.msra.mxu1 %v5038_v3  ;;  %v6411_v3 = vsub.f32 %v11482_v43, %v6410_v26 }
 0x1f7   :  { %9827 = vmatpush3.xpose.msra.mxu0 %v4592_v18  ;;  %9858 = vmatprep.mubr.msk.f32.mxu1 %vm10493_vm1, %v10492_v15 }
 0x1f8   :  { %9861 = vmatprep.subr.mxu1 %v10492_v15  ;;  %9828 = vmatprep.mubr.msk.f32.mxu0 %vm10493_vm1, %v10492_v15  ;;  %v6412_v29 = vand.u32 4294901760, %v6411_v3 }
 0x1f9   :  { %9831 = vmatprep.subr.mxu0 %v10492_v15 }
 0x1fd   :  { %9859 = vmatmul.mubr.f32.vlgmr.msra.gmra.mrb[14].mxu1 %v11328_v25 }
 0x1fe   :  { %9829 = vmatmul.mubr.f32.vlgmr.msra.gmra.mrb[14].mxu0 %v11330_v53  ;;  %9862 = vmatpush3.xpose.msra.mxu1 %v11339_v55 }
 0x1ff   :  { %9832 = vmatpush3.xpose.msra.mxu0 %v11342_v14  ;;  %9863 = vmatprep.mubr.msk.f32.mxu1 %vm10493_vm1, %v10492_v15 }
 0x200   :  { %9833 = vmatprep.mubr.msk.f32.mxu0 %vm10493_vm1, %v10492_v15  ;;  %9896 = vmatprep.subr.mxu1 %v10492_v15 }
 0x201   :  { %9866 = vmatprep.subr.mxu0 %v10492_v15 }
 0x205   :  { %9864 = vmatmul.mubr.f32.vlgmr.msra.gmra.mrb[14].mxu1 %v11328_v25 }
 0x206   :  { %9834 = vmatmul.mubr.f32.vlgmr.msra.gmra.mrb[14].mxu0 %v11330_v53  ;;  %9897 = vmatpush3.msra.mxu1 %v11414_v58 }
 0x207   :  { %9898 = vmatprep.mubr.msk.f32.mxu1 %vm10493_vm1, %v10492_v15  ;;  %9867 = vmatpush3.msra.mxu0 %v11416_v24 }
 0x208   :  { %9868 = vmatprep.mubr.msk.f32.mxu0 %vm10493_vm1, %v10492_v15  ;;  %9901 = vmatprep.subr.mxu1 %v10492_v15 }
 0x209   :  { %9871 = vmatprep.subr.mxu0 %v10492_v15 }
 0x254   :  { %v2725_v60 = vpop.f32.mrb[8].mxu1 }
 0x255   :  { %v2279_v7 = vpop.f32.mrb[8].mxu0  ;;  %v5880_v50 = vsel %vm5405_vm3, %v2725_v60, 0  ;;  %v9685_v45 = vpop.f32.mrb[9].mxu1  ;;  %v5409_v35 = vsel %vm5405_vm3, %v2725_v60, 0.0 }
 0x256   :  { %v5431_v20 = vsel %vm5405_vm3, %v2279_v7, 0  ;;  %v9655_v61 = vpop.f32.mrb[9].mxu0  ;;  %v5406_v52 = vsel %vm5405_vm3, %v2279_v7, 0.0  ;;  %v11434_v57 = vand.u32 4294901760, %v5880_v50  ;;  %5410 = vadd.xlane.f32.xlu1 %v5409_v35 }
 0x257   :  { %v11436_v47 = vand.u32 4294901760, %v5431_v20  ;;  %5407 = vadd.xlane.f32.xlu0 %v5406_v52 }
 0x258   :  { %v5949_v16 = vsub.f32 %v5880_v50, %v11434_v57 }
 0x259   :  { %v5500_v51 = vsub.f32 %v5431_v20, %v11436_v47 }
 0x25a   :  { %v5950_v31 = vand.u32 4294901760, %v5949_v16 }
 0x25b   :  { %v5501_v23 = vand.u32 4294901760, %v5500_v51 }
 0x25c   :  { %v5951_v4 = vsub.f32 %v5949_v16, %v5950_v31 }
 0x25d   :  { %v5502_v62 = vsub.f32 %v5500_v51, %v5501_v23 }
 0x25e   :  { %v5952_v8 = vand.u32 4294901760, %v5951_v4 }
 0x25f   :  { %v5503_v5 = vand.u32 4294901760, %v5502_v62 }
 0x260   :  { %9899 = vmatmul.mubr.f32.vlgmr.msra.gmra.mrb[16].mxu1 %v5952_v8  ;;  %v1836_v8 = vld [vmem:[%s11765_s2 + $0x38] sm:$0xff] }
 0x261   :  { %9869 = vmatmul.mubr.f32.vlgmr.msra.gmra.mrb[16].mxu0 %v5503_v5  ;;  %9902 = vmatpush3.msra.mxu1 %v5963_v32  ;;  %v1835_v5 = vld [vmem:[%s11765_s2 + $0x30] sm:$0xff] }
 0x262   :  { %9903 = vmatprep.mubr.msk.f32.mxu1 %vm10493_vm1, %v10492_v15  ;;  %9872 = vmatpush3.msra.mxu0 %v5514_v6  ;;  %v11634_v6 = vand.u32 4294901760, %v1836_v8  ;;  %v11642_v21 = vand.u32 4294901760, %v1835_v5 }
 0x263   :  { %9873 = vmatprep.mubr.msk.f32.mxu0 %vm10493_vm1, %v10492_v15  ;;  %9906 = vmatprep.subr.mxu1 %v10492_v15 }
 0x264   :  { %9876 = vmatprep.subr.mxu0 %v10492_v15  ;;  %v11647_v39 = vsub.f32 %v1836_v8, %v11634_v6 }
 0x268   :  { %9904 = vmatmul.mubr.f32.vlgmr.msra.gmra.mrb[16].mxu1 %v11434_v57 }
 0x269   :  { %9874 = vmatmul.mubr.f32.vlgmr.msra.gmra.mrb[16].mxu0 %v11436_v47  ;;  %9907 = vmatpush3.msra.mxu1 %v5960_v10 }
 0x26a   :  { %9908 = vmatprep.mubr.msk.f32.mxu1 %vm10493_vm1, %v10492_v15  ;;  %9877 = vmatpush3.msra.mxu0 %v5511_v12  ;;  %v7757_v12 = vand.u32 4294901760, %v11563_v56 }
 0x26b   :  { %9878 = vmatprep.mubr.msk.f32.mxu0 %vm10493_vm1, %v10492_v15  ;;  %9911 = vmatprep.subr.mxu1 %v10492_v15 }
 0x26c   :  { %9881 = vmatprep.subr.mxu0 %v10492_v15 }
 0x270   :  { %9909 = vmatmul.mubr.f32.vlgmr.msra.gmra.mrb[16].mxu1 %v5949_v16 }
 0x271   :  { %9879 = vmatmul.mubr.f32.vlgmr.msra.gmra.mrb[16].mxu0 %v5500_v51  ;;  %9912 = vmatpush3.msra.mxu1 %v11414_v58 }
 0x272   :  { %9913 = vmatprep.mubr.msk.f32.mxu1 %vm10493_vm1, %v10492_v15  ;;  %9882 = vmatpush3.msra.mxu0 %v11416_v24 }
 0x273   :  { %9883 = vmatprep.mubr.msk.f32.mxu0 %vm10493_vm1, %v10492_v15  ;;  %9916 = vmatprep.subr.mxu1 %v10492_v15 }
 0x274   :  { %9886 = vmatprep.subr.mxu0 %v10492_v15 }
 0x278   :  { %9914 = vmatmul.mubr.f32.vlgmr.msra.gmra.mrb[16].mxu1 %v5950_v31 }
 0x279   :  { %9884 = vmatmul.mubr.f32.vlgmr.msra.gmra.mrb[16].mxu0 %v5501_v23  ;;  %9917 = vmatpush3.msra.mxu1 %v5961_v59 }
 0x27a   :  { %9918 = vmatprep.mubr.msk.f32.mxu1 %vm10493_vm1, %v10492_v15  ;;  %9887 = vmatpush3.msra.mxu0 %v5512_v11  ;;  %v7758_v11 = vsub.f32 %v11563_v56, %v7757_v12 }
 0x27b   :  { %9888 = vmatprep.mubr.msk.f32.mxu0 %vm10493_vm1, %v10492_v15  ;;  %9921 = vmatprep.subr.mxu1 %v10492_v15 }
 0x27c   :  { %9891 = vmatprep.subr.mxu0 %v10492_v15  ;;  %v7759_v63 = vand.u32 4294901760, %v7758_v11 }
 0x280   :  { %v3617_v49 = vpop.f32.mrb[10].mxu1  ;;  %9919 = vmatmul.mubr.f32.vlgmr.msra.gmra.mrb[16].mxu1 %v11434_v57 }
 0x281   :  { %v3171_v54 = vpop.f32.mrb[10].mxu0  ;;  %9889 = vmatmul.mubr.f32.vlgmr.msra.gmra.mrb[16].mxu0 %v11436_v47  ;;  %v6778_v46 = vsel %vm5405_vm3, %v3617_v49, 0  ;;  %v9745_v1 = vpop.f32.mrb[11].mxu1  ;;  %v5415_v22 = vsel %vm5405_vm3, %v3617_v49, 0.0  ;;  %9922 = vmatpush3.msra.mxu1 %v11414_v58  ;;  %v11566_v58 = vsub.f32 %v1833_v0, %v11558_v42 }
 0x282   :  { %v6329_v34 = vsel %vm5405_vm3, %v3171_v54, 0  ;;  %v9715_v25 = vpop.f32.mrb[11].mxu0  ;;  %v5412_v53 = vsel %vm5405_vm3, %v3171_v54, 0.0  ;;  %9923 = vmatprep.mubr.msk.f32.mxu1 %vm10493_vm1, %v10492_v15  ;;  %v11494_v55 = vand.u32 4294901760, %v6778_v46  ;;  %5416 = vadd.xlane.f32.xlu1 %v5415_v22 }
 0x283   :  { %v11496_v14 = vand.u32 4294901760, %v6329_v34  ;;  %5413 = vadd.xlane.f32.xlu0 %v5412_v53  ;;  %9892 = vmatpush3.msra.mxu0 %v11416_v24  ;;  %v7308_v52 = vand.u32 4294901760, %v11566_v58 }
 0x284   :  { %9893 = vmatprep.mubr.msk.f32.mxu0 %vm10493_vm1, %v10492_v15  ;;  %v6847_v2 = vsub.f32 %v6778_v46, %v11494_v55  ;;  %9956 = vmatprep.subr.mxu1 %v10492_v15 }
 0x285   :  { %v6398_v30 = vsub.f32 %v6329_v34, %v11496_v14  ;;  %9926 = vmatprep.subr.mxu0 %v10492_v15  ;;  %v7309_v17 = vsub.f32 %v11566_v58, %v7308_v52 }
 0x286   :  { %v6848_v27 = vand.u32 4294901760, %v6847_v2 }
 0x287   :  { %v6399_v28 = vand.u32 4294901760, %v6398_v30  ;;  %v7310_v32 = vand.u32 4294901760, %v7309_v17 }
 0x288   :  { %v6849_v18 = vsub.f32 %v6847_v2, %v6848_v27  ;;  %9924 = vmatmul.mubr.f32.vlgmr.msra.gmra.mrb[16].mxu1 %v11434_v57 }
 0x289   :  { %v6400_v40 = vsub.f32 %v6398_v30, %v6399_v28  ;;  %9894 = vmatmul.mubr.f32.vlgmr.msra.gmra.mrb[16].mxu0 %v11436_v47  ;;  %9957 = vmatpush3.msra.mxu1 %v11468_v33 }
 0x28a   :  { %9958 = vmatprep.mubr.msk.f32.mxu1 %vm10493_vm1, %v10492_v15  ;;  %9927 = vmatpush3.msra.mxu0 %v11474_v9  ;;  %v6850_v48 = vand.u32 4294901760, %v6849_v18 }
 0x28b   :  { %9928 = vmatprep.mubr.msk.f32.mxu0 %vm10493_vm1, %v10492_v15  ;;  %v6401_v44 = vand.u32 4294901760, %v6400_v40  ;;  %9961 = vmatprep.subr.mxu1 %v10492_v15 }
 0x28c   :  { %9931 = vmatprep.subr.mxu0 %v10492_v15  ;;  %9959 = vmatmul.mubr.f32.vlgmr.msra.gmra.mrb[18].mxu1 %v6850_v48 }
 0x28d   :  { %9929 = vmatmul.mubr.f32.vlgmr.msra.gmra.mrb[18].mxu0 %v6401_v44  ;;  %9962 = vmatpush3.msra.mxu1 %v6861_v36 }
 0x28e   :  { %9963 = vmatprep.mubr.msk.f32.mxu1 %vm10493_vm1, %v10492_v15  ;;  %9932 = vmatpush3.msra.mxu0 %v6412_v29 }
 0x28f   :  { %9933 = vmatprep.mubr.msk.f32.mxu0 %vm10493_vm1, %v10492_v15  ;;  %9966 = vmatprep.subr.mxu1 %v10492_v15 }
 0x290   :  { %9936 = vmatprep.subr.mxu0 %v10492_v15 }
 0x294   :  { %9964 = vmatmul.mubr.f32.vlgmr.msra.gmra.mrb[18].mxu1 %v11494_v55 }
 0x295   :  { %9934 = vmatmul.mubr.f32.vlgmr.msra.gmra.mrb[18].mxu0 %v11496_v14  ;;  %9967 = vmatpush3.msra.mxu1 %v11479_v19 }
 0x296   :  { %9968 = vmatprep.mubr.msk.f32.mxu1 %vm10493_vm1, %v10492_v15  ;;  %9937 = vmatpush3.msra.mxu0 %v11482_v43  ;;  %v8655_v43 = vand.u32 4294901760, %v11647_v39 }
 0x297   :  { %9938 = vmatprep.mubr.msk.f32.mxu0 %vm10493_vm1, %v10492_v15  ;;  %9971 = vmatprep.subr.mxu1 %v10492_v15 }
 0x298   :  { %9941 = vmatprep.subr.mxu0 %v10492_v15 }
 0x29c   :  { %9969 = vmatmul.mubr.f32.vlgmr.msra.gmra.mrb[18].mxu1 %v6847_v2 }
 0x29d   :  { %9939 = vmatmul.mubr.f32.vlgmr.msra.gmra.mrb[18].mxu0 %v6398_v30  ;;  %9972 = vmatpush3.msra.mxu1 %v11468_v33 }
 0x29e   :  { %9973 = vmatprep.mubr.msk.f32.mxu1 %vm10493_vm1, %v10492_v15  ;;  %9942 = vmatpush3.msra.mxu0 %v11474_v9 }
 0x29f   :  { %9943 = vmatprep.mubr.msk.f32.mxu0 %vm10493_vm1, %v10492_v15  ;;  %9976 = vmatprep.subr.mxu1 %v10492_v15 }
 0x2a0   :  { %9946 = vmatprep.subr.mxu0 %v10492_v15 }
 0x2a4   :  { %9974 = vmatmul.mubr.f32.vlgmr.msra.gmra.mrb[18].mxu1 %v6848_v27 }
 0x2a5   :  { %9944 = vmatmul.mubr.f32.vlgmr.msra.gmra.mrb[18].mxu0 %v6399_v28  ;;  %9977 = vmatpush3.msra.mxu1 %v6859_v38 }
 0x2a6   :  { %9978 = vmatprep.mubr.msk.f32.mxu1 %vm10493_vm1, %v10492_v15  ;;  %9947 = vmatpush3.msra.mxu0 %v6410_v26  ;;  %v8656_v26 = vsub.f32 %v11647_v39, %v8655_v43 }
 0x2a7   :  { %9948 = vmatprep.mubr.msk.f32.mxu0 %vm10493_vm1, %v10492_v15  ;;  %9981 = vmatprep.subr.mxu1 %v10492_v15 }
 0x2a8   :  { %9951 = vmatprep.subr.mxu0 %v10492_v15  ;;  %v8657_v3 = vand.u32 4294901760, %v8656_v26 }
 0x2ac   :  { %v4509_v24 = vpop.f32.mrb[12].mxu1  ;;  %9979 = vmatmul.mubr.f32.vlgmr.msra.gmra.mrb[18].mxu1 %v11494_v55 }
 0x2ad   :  { %v4063_v10 = vpop.f32.mrb[12].mxu0  ;;  %9949 = vmatmul.mubr.f32.vlgmr.msra.gmra.mrb[18].mxu0 %v11496_v14  ;;  %v7676_v60 = vsel %vm5405_vm3, %v4509_v24, 0  ;;  %v9805_v59 = vpop.f32.mrb[13].mxu1  ;;  %v5421_v50 = vsel %vm5405_vm3, %v4509_v24, 0.0  ;;  %9982 = vmatpush3.msra.mxu1 %v11468_v33  ;;  %v11650_v33 = vsub.f32 %v1835_v5, %v11642_v21 }
 0x2ae   :  { %v7227_v7 = vsel %vm5405_vm3, %v4063_v10, 0  ;;  %v9775_v20 = vpop.f32.mrb[13].mxu0  ;;  %v5418_v45 = vsel %vm5405_vm3, %v4063_v10, 0.0  ;;  %9983 = vmatprep.mubr.msk.f32.mxu1 %vm10493_vm1, %v10492_v15  ;;  %v11578_v35 = vand.u32 4294901760, %v7676_v60  ;;  %5422 = vadd.xlane.f32.xlu1 %v5421_v50 }
 0x2af   :  { %v11580_v61 = vand.u32 4294901760, %v7227_v7  ;;  %5419 = vadd.xlane.f32.xlu0 %v5418_v45  ;;  %9952 = vmatpush3.msra.mxu0 %v11474_v9  ;;  %v8206_v53 = vand.u32 4294901760, %v11650_v33 }
 0x2b0   :  { %9953 = vmatprep.mubr.msk.f32.mxu0 %vm10493_vm1, %v10492_v15  ;;  %v7745_v57 = vsub.f32 %v7676_v60, %v11578_v35  ;;  %10016 = vmatprep.subr.mxu1 %v10492_v15 }
 0x2b1   :  { %v7296_v47 = vsub.f32 %v7227_v7, %v11580_v61  ;;  %9986 = vmatprep.subr.mxu0 %v10492_v15  ;;  %v8207_v37 = vsub.f32 %v11650_v33, %v8206_v53 }
 0x2b2   :  { %v7746_v16 = vand.u32 4294901760, %v7745_v57 }
 0x2b3   :  { %v7297_v51 = vand.u32 4294901760, %v7296_v47  ;;  %v8208_v36 = vand.u32 4294901760, %v8207_v37 }
 0x2b4   :  { %v7747_v31 = vsub.f32 %v7745_v57, %v7746_v16  ;;  %9984 = vmatmul.mubr.f32.vlgmr.msra.gmra.mrb[18].mxu1 %v11494_v55 }
 0x2b5   :  { %v7298_v23 = vsub.f32 %v7296_v47, %v7297_v51  ;;  %9954 = vmatmul.mubr.f32.vlgmr.msra.gmra.mrb[18].mxu0 %v11496_v14  ;;  %10017 = vmatpush3.msra.mxu1 %v11550_v41 }
 0x2b6   :  { %10018 = vmatprep.mubr.msk.f32.mxu1 %vm10493_vm1, %v10492_v15  ;;  %9987 = vmatpush3.msra.mxu0 %v11558_v42  ;;  %v7748_v4 = vand.u32 4294901760, %v7747_v31 }
 0x2b7   :  { %9988 = vmatprep.mubr.msk.f32.mxu0 %vm10493_vm1, %v10492_v15  ;;  %v7299_v62 = vand.u32 4294901760, %v7298_v23  ;;  %10021 = vmatprep.subr.mxu1 %v10492_v15 }
 0x2b8   :  { %9991 = vmatprep.subr.mxu0 %v10492_v15  ;;  %10019 = vmatmul.mubr.f32.vlgmr.msra.gmra.mrb[20].mxu1 %v7748_v4 }
 0x2b9   :  { %9989 = vmatmul.mubr.f32.vlgmr.msra.gmra.mrb[20].mxu0 %v7299_v62  ;;  %10022 = vmatpush3.msra.mxu1 %v7759_v63 }
 0x2ba   :  { %10023 = vmatprep.mubr.msk.f32.mxu1 %vm10493_vm1, %v10492_v15  ;;  %9992 = vmatpush3.msra.mxu0 %v7310_v32 }
 0x2bb   :  { %9993 = vmatprep.mubr.msk.f32.mxu0 %vm10493_vm1, %v10492_v15  ;;  %10026 = vmatprep.subr.mxu1 %v10492_v15 }
 0x2bc   :  { %9996 = vmatprep.subr.mxu0 %v10492_v15 }
 0x2c0   :  { %10024 = vmatmul.mubr.f32.vlgmr.msra.gmra.mrb[20].mxu1 %v11578_v35 }
 0x2c1   :  { %9994 = vmatmul.mubr.f32.vlgmr.msra.gmra.mrb[20].mxu0 %v11580_v61  ;;  %10027 = vmatpush3.msra.mxu1 %v11563_v56 }
 0x2c2   :  { %10028 = vmatprep.mubr.msk.f32.mxu1 %vm10493_vm1, %v10492_v15  ;;  %9997 = vmatpush3.msra.mxu0 %v11566_v58 }
 0x2c3   :  { %9998 = vmatprep.mubr.msk.f32.mxu0 %vm10493_vm1, %v10492_v15  ;;  %10031 = vmatprep.subr.mxu1 %v10492_v15 }
 0x2c4   :  { %10001 = vmatprep.subr.mxu0 %v10492_v15 }
 0x2c8   :  { %10029 = vmatmul.mubr.f32.vlgmr.msra.gmra.mrb[20].mxu1 %v7745_v57 }
 0x2c9   :  { %9999 = vmatmul.mubr.f32.vlgmr.msra.gmra.mrb[20].mxu0 %v7296_v47  ;;  %10032 = vmatpush3.msra.mxu1 %v11550_v41 }
 0x2ca   :  { %10033 = vmatprep.mubr.msk.f32.mxu1 %vm10493_vm1, %v10492_v15  ;;  %10002 = vmatpush3.msra.mxu0 %v11558_v42 }
 0x2cb   :  { %10003 = vmatprep.mubr.msk.f32.mxu0 %vm10493_vm1, %v10492_v15  ;;  %10036 = vmatprep.subr.mxu1 %v10492_v15 }
 0x2cc   :  { %10006 = vmatprep.subr.mxu0 %v10492_v15 }
 0x2d0   :  { %10034 = vmatmul.mubr.f32.vlgmr.msra.gmra.mrb[20].mxu1 %v7746_v16 }
 0x2d1   :  { %10004 = vmatmul.mubr.f32.vlgmr.msra.gmra.mrb[20].mxu0 %v7297_v51  ;;  %10037 = vmatpush3.msra.mxu1 %v7757_v12 }
 0x2d2   :  { %10038 = vmatprep.mubr.msk.f32.mxu1 %vm10493_vm1, %v10492_v15  ;;  %10007 = vmatpush3.msra.mxu0 %v7308_v52 }
 0x2d3   :  { %10008 = vmatprep.mubr.msk.f32.mxu0 %vm10493_vm1, %v10492_v15  ;;  %10041 = vmatprep.subr.mxu1 %v10492_v15 }
 0x2d4   :  { %10011 = vmatprep.subr.mxu0 %v10492_v15 }
 0x2d8   :  { %v5401_v9 = vpop.f32.mrb[14].mxu1  ;;  %10039 = vmatmul.mubr.f32.vlgmr.msra.gmra.mrb[20].mxu1 %v11578_v35 }
 0x2d9   :  { %v4955_v19 = vpop.f32.mrb[14].mxu0  ;;  %10009 = vmatmul.mubr.f32.vlgmr.msra.gmra.mrb[20].mxu0 %v11580_v61  ;;  %v8574_v49 = vsel %vm5405_vm3, %v5401_v9, 0  ;;  %v9865_v38 = vpop.f32.mrb[15].mxu1  ;;  %v5427_v46 = vsel %vm5405_vm3, %v5401_v9, 0.0  ;;  %10042 = vmatpush3.msra.mxu1 %v11550_v41 }
 0x2da   :  { %v8125_v54 = vsel %vm5405_vm3, %v4955_v19, 0  ;;  %v9835_v34 = vpop.f32.mrb[15].mxu0  ;;  %v5424_v1 = vsel %vm5405_vm3, %v4955_v19, 0.0  ;;  %10043 = vmatprep.mubr.msk.f32.mxu1 %vm10493_vm1, %v10492_v15  ;;  %v11662_v22 = vand.u32 4294901760, %v8574_v49  ;;  %5428 = vadd.xlane.f32.xlu1 %v5427_v46 }
 0x2db   :  { %v11664_v25 = vand.u32 4294901760, %v8125_v54  ;;  %5425 = vadd.xlane.f32.xlu0 %v5424_v1  ;;  %10012 = vmatpush3.msra.mxu0 %v11558_v42 }
 0x2dc   :  { %10013 = vmatprep.mubr.msk.f32.mxu0 %vm10493_vm1, %v10492_v15  ;;  %v8643_v55 = vsub.f32 %v8574_v49, %v11662_v22  ;;  %10076 = vmatprep.subr.mxu1 %v10492_v15 }
 0x2dd   :  { %v8194_v14 = vsub.f32 %v8125_v54, %v11664_v25  ;;  %10046 = vmatprep.subr.mxu0 %v10492_v15 }
 0x2de   :  { %v8644_v2 = vand.u32 4294901760, %v8643_v55 }
 0x2df   :  { %v8195_v30 = vand.u32 4294901760, %v8194_v14 }
 0x2e0   :  { %v8645_v27 = vsub.f32 %v8643_v55, %v8644_v2  ;;  %10044 = vmatmul.mubr.f32.vlgmr.msra.gmra.mrb[20].mxu1 %v11578_v35 }
 0x2e1   :  { %v8196_v28 = vsub.f32 %v8194_v14, %v8195_v30  ;;  %10014 = vmatmul.mubr.f32.vlgmr.msra.gmra.mrb[20].mxu0 %v11580_v61  ;;  %10077 = vmatpush3.msra.mxu1 %v11634_v6 }
 0x2e2   :  { %10078 = vmatprep.mubr.msk.f32.mxu1 %vm10493_vm1, %v10492_v15  ;;  %v8646_v18 = vand.u32 4294901760, %v8645_v27  ;;  %10047 = vmatpush3.msra.mxu0 %v11642_v21 }
 0x2e3   :  { %10048 = vmatprep.mubr.msk.f32.mxu0 %vm10493_vm1, %v10492_v15  ;;  %v8197_v40 = vand.u32 4294901760, %v8196_v28  ;;  %10081 = vmatprep.subr.mxu1 %v10492_v15  ;;  %v5411_v48 = vpop.xlane.xlu1 %5410 }
 0x2e4   :  { %10051 = vmatprep.subr.mxu0 %v10492_v15  ;;  %10079 = vmatmul.mubr.f32.vlgmr.msra.gmra.mrb[22].mxu1 %v8646_v18  ;;  %v5408_v44 = vpop.xlane.xlu0 %5407  ;;  %10476 = vrcp.f32 %v5411_v48 }
 0x2e5   :  { %10049 = vmatmul.mubr.f32.vlgmr.msra.gmra.mrb[22].mxu0 %v8197_v40  ;;  %10082 = vmatpush3.msra.mxu1 %v8657_v3  ;;  %10478 = vrcp.f32 %v5408_v44 }
 0x2e6   :  { %10083 = vmatprep.mubr.msk.f32.mxu1 %vm10493_vm1, %v10492_v15  ;;  %10052 = vmatpush3.msra.mxu0 %v8208_v36 }
 0x2e7   :  { %10053 = vmatprep.mubr.msk.f32.mxu0 %vm10493_vm1, %v10492_v15  ;;  %10086 = vmatprep.subr.mxu1 %v10492_v15 }
 0x2e8   :  { %10056 = vmatprep.subr.mxu0 %v10492_v15 }
 0x2ec   :  { %10084 = vmatmul.mubr.f32.vlgmr.msra.gmra.mrb[22].mxu1 %v11662_v22 }
 0x2ed   :  { %10054 = vmatmul.mubr.f32.vlgmr.msra.gmra.mrb[22].mxu0 %v11664_v25  ;;  %10087 = vmatpush3.msra.mxu1 %v11647_v39 }
 0x2ee   :  { %10088 = vmatprep.mubr.msk.f32.mxu1 %vm10493_vm1, %v10492_v15  ;;  %10057 = vmatpush3.msra.mxu0 %v11650_v33  ;;  %v10477_v29 = vpop.eup %10476 }
 0x2ef   :  { %10058 = vmatprep.mubr.msk.f32.mxu0 %vm10493_vm1, %v10492_v15  ;;  %10091 = vmatprep.subr.mxu1 %v10492_v15  ;;  %v10479_v13 = vpop.eup %10478 }
 0x2f0   :  { %10061 = vmatprep.subr.mxu0 %v10492_v15 }
 0x2f4   :  { %10089 = vmatmul.mubr.f32.vlgmr.msra.gmra.mrb[22].mxu1 %v8643_v55 }
 0x2f5   :  { %10059 = vmatmul.mubr.f32.vlgmr.msra.gmra.mrb[22].mxu0 %v8194_v14  ;;  %10092 = vmatpush3.msra.mxu1 %v11634_v6 }
 0x2f6   :  { %10093 = vmatprep.mubr.msk.f32.mxu1 %vm10493_vm1, %v10492_v15  ;;  %10062 = vmatpush3.msra.mxu0 %v11642_v21 }
 0x2f7   :  { %10063 = vmatprep.mubr.msk.f32.mxu0 %vm10493_vm1, %v10492_v15  ;;  %10096 = vmatprep.subr.mxu1 %v10492_v15 }
 0x2f8   :  { %10066 = vmatprep.subr.mxu0 %v10492_v15 }
 0x2fc   :  { %10094 = vmatmul.mubr.f32.vlgmr.msra.gmra.mrb[22].mxu1 %v8644_v2 }
 0x2fd   :  { %10064 = vmatmul.mubr.f32.vlgmr.msra.gmra.mrb[22].mxu0 %v8195_v30  ;;  %10097 = vmatpush3.msra.mxu1 %v8655_v43 }
 0x2fe   :  { %10098 = vmatprep.mubr.msk.f32.mxu1 %vm10493_vm1, %v10492_v15  ;;  %10067 = vmatpush3.msra.mxu0 %v8206_v53 }
 0x2ff   :  { %10068 = vmatprep.mubr.msk.f32.mxu0 %vm10493_vm1, %v10492_v15  ;;  %10101 = vmatprep.subr.mxu1 %v10492_v15 }
 0x300   :  { %10071 = vmatprep.subr.mxu0 %v10492_v15 }
 0x304   :  { %10099 = vmatmul.mubr.f32.vlgmr.msra.gmra.mrb[22].mxu1 %v11662_v22 }
 0x305   :  { %10069 = vmatmul.mubr.f32.vlgmr.msra.gmra.mrb[22].mxu0 %v11664_v25  ;;  %10102 = vmatpush3.msra.mxu1 %v11634_v6 }
 0x306   :  { %10103 = vmatprep.mubr.msk.f32.mxu1 %vm10493_vm1, %v10492_v15  ;;  %10072 = vmatpush3.msra.mxu0 %v11642_v21 }
 0x307   :  { %10073 = vmatprep.mubr.msk.f32.mxu0 %vm10493_vm1, %v10492_v15 }
 0x30c   :  { %10104 = vmatmul.mubr.f32.vlgmr.msra.gmra.mrb[22].mxu1 %v11662_v22 }
 0x30d   :  { %10074 = vmatmul.mubr.f32.vlgmr.msra.gmra.mrb[22].mxu0 %v11664_v25 }
 0x30f   :  { %v5417_v15 = vpop.xlane.xlu1 %5416 }
 0x310   :  { %v5414_v10 = vpop.xlane.xlu0 %5413  ;;  %10480 = vrcp.f32 %v5417_v15 }
 0x311   :  { %10482 = vrcp.f32 %v5414_v10 }
 0x31a   :  { %v10481_v12 = vpop.eup %10480 }
 0x31b   :  { %v10483_v60 = vpop.eup %10482 }
 0x33b   :  { %v5423_v61 = vpop.xlane.xlu1 %5422 }
 0x33c   :  { %v5420_v52 = vpop.xlane.xlu0 %5419  ;;  %10484 = vrcp.f32 %v5423_v61 }
 0x33d   :  { %10486 = vrcp.f32 %v5420_v52 }
 0x346   :  { %v10485_v57 = vpop.eup %10484 }
 0x347   :  { %v10487_v47 = vpop.eup %10486 }
 0x35b   :  { %v6324_v0 = vpop.f32.mrb[16].mxu1 }
 0x35c   :  { %v5875_v41 = vpop.f32.mrb[16].mxu0  ;;  %v9025_v42 = vmul.f32 %v10477_v29, %v6324_v0  ;;  %v9925_v58 = vpop.f32.mrb[17].mxu1 }
 0x35d   :  { %v9023_v56 = vmul.f32 %v10479_v13, %v5875_v41  ;;  %v9895_v24 = vpop.f32.mrb[17].mxu0 }
 0x35e   :  { %9039 = vst.msk [vmem:[%s11766_s4 + $0x8] sm:$0xff] %vm29_vm0, %v9025_v42 }
 0x35f   :  { %9038 = vst.msk [vmem:[%s11766_s4] sm:$0xff] %vm29_vm0, %v9023_v56 }
 0x367   :  { %v5429_v63 = vpop.xlane.xlu1 %5428 }
 0x368   :  { %v5426_v4 = vpop.xlane.xlu0 %5425  ;;  %10488 = vrcp.f32 %v5429_v63 }
 0x369   :  { %10490 = vrcp.f32 %v5426_v4 }
 0x372   :  { %v10489_v62 = vpop.eup %10488 }
 0x373   :  { %v10491_v32 = vpop.eup %10490 }
 0x387   :  { %v7222_v7 = vpop.f32.mrb[18].mxu1 }
 0x388   :  { %v6773_v59 = vpop.f32.mrb[18].mxu0  ;;  %v9029_v50 = vmul.f32 %v10481_v12, %v7222_v7  ;;  %v9985_v45 = vpop.f32.mrb[19].mxu1 }
 0x389   :  { %v9027_v20 = vmul.f32 %v10483_v60, %v6773_v59  ;;  %v9955_v35 = vpop.f32.mrb[19].mxu0 }
 0x38a   :  { %9041 = vst.msk [vmem:[%s11766_s4 + $0x18] sm:$0xff] %vm29_vm0, %v9029_v50 }
 0x38b   :  { %9040 = vst.msk [vmem:[%s11766_s4 + $0x10] sm:$0xff] %vm29_vm0, %v9027_v20 }
 0x3b3   :  { %v8120_v11 = vpop.f32.mrb[20].mxu1 }
 0x3b4   :  { %v7671_v16 = vpop.f32.mrb[20].mxu0  ;;  %v9033_v51 = vmul.f32 %v10485_v57, %v8120_v11  ;;  %v10045_v31 = vpop.f32.mrb[21].mxu1 }
 0x3b5   :  { %v9031_v17 = vmul.f32 %v10487_v47, %v7671_v16  ;;  %v10015_v23 = vpop.f32.mrb[21].mxu0 }
 0x3b6   :  { %9043 = vst.msk [vmem:[%s11766_s4 + $0x28] sm:$0xff] %vm29_vm0, %v9033_v51 }
 0x3b7   :  { %9042 = vst.msk [vmem:[%s11766_s4 + $0x20] sm:$0xff] %vm29_vm0, %v9031_v17 }
 0x3df   :  { %v9018_v8 = vpop.f32.mrb[22].mxu1 }
 0x3e0   :  { %v8569_v5 = vpop.f32.mrb[22].mxu0  ;;  %v9037_v6 = vmul.f32 %v10489_v62, %v9018_v8  ;;  %v10105_v39 = vpop.f32.mrb[23].mxu1 }
 0x3e1   :  { %v9035_v21 = vmul.f32 %v10491_v32, %v8569_v5  ;;  %v10075_v33 = vpop.f32.mrb[23].mxu0 }
 0x3e2   :  { %9045 = vst.msk [vmem:[%s11766_s4 + $0x38] sm:$0xff] %vm29_vm0, %v9037_v6 }
 0x3e3   :  { %9044 = vst.msk [vmem:[%s11766_s4 + $0x30] sm:$0xff] %vm29_vm0, %v9035_v21 }

</bundles_post_ra>
